<compile_context>
chip_gen: v7x
topology: tpu7x:2x2x1
jax: 0.10.0
libtpu: 0.0.40
codegen_flags: <defaults>
</compile_context>

<pallas_src>
import functools
import math

import jax
import jax.numpy as jnp
from jax.experimental import pallas as pl
from jax.experimental.pallas import tpu as pltpu


def _round_up(x, m):
    return ((x + m - 1) // m) * m


def _mlp_attn_kernel(valid_len_ref,              # SMEM (B,) int32 (scalar prefetch)
                     q_ref, k_ref, v_ref,        # (1,tq,Dq) (1,K,Dk) (1,K,Vp)
                     wq_ref, wkt_ref, vv_ref,    # (Dq,Uf) (Uf,Dk) SMEM (U,)
                     o_ref,                      # (1,tq,Vp)
                     kf_ref,                     # VMEM scratch (Uf,K) f32: per-batch key feats
                     *, units):
    b = pl.program_id(0)
    tq = q_ref.shape[1]
    K = k_ref.shape[1]

    # Key projection once per batch, stored transposed (units, K) so K sits on the lane
    # axis of the score accumulator.  Reused by every query tile of this batch.
    @pl.when(pl.program_id(1) == 0)
    def _():
        kf_ref[...] = jnp.dot(wkt_ref[...], k_ref[0].T,
                              preferred_element_type=jnp.float32)

    # Query projection for this tile (MXU, f32 accumulation).
    qf = jnp.dot(q_ref[0], wq_ref[...], preferred_element_type=jnp.float32)   # (tq, Uf)

    # Additive-attention scores with a 2-D accumulator: loop over the *real* units only.
    # No (tq, K, U) temporary, no unit padding, no cross-lane reduce.
    scores = jnp.zeros((tq, K), jnp.float32)
    for u in range(units):                       # static, small U -> fully unrolled
        q_u = qf[:, u:u + 1]                     # (tq, 1) -> broadcast over K lanes
        k_u = kf_ref[u:u + 1, :]                 # (1, K)  -> broadcast over tq sublanes
        scores = scores + vv_ref[u] * jnp.tanh(q_u + k_u)
    # TODO(synk): for very large `units`, switch to a chunked lax.fori_loop accumulation.

    # masked_softmax: invalid key positions filled with -1e6 (matches the torch reference).
    kv_ids = jax.lax.broadcasted_iota(jnp.int32, scores.shape, 1)
    scores = jnp.where(kv_ids < valid_len_ref[b], scores, jnp.float32(-1e6))
    m = jnp.max(scores, axis=-1, keepdims=True)
    e = jnp.exp(scores - m)
    w = e * pl.reciprocal(jnp.sum(e, axis=-1, keepdims=True), approx=True)

    # TODO(synk): training-mode dropout on the attention weights (pltpu PRNG); identity in eval.

    out = jnp.dot(w.astype(v_ref.dtype), v_ref[0],
                  preferred_element_type=jnp.float32)                          # (tq, Vp)
    o_ref[0] = out.astype(o_ref.dtype)


@functools.partial(jax.jit, static_argnames=("tile_q", "compute_dtype"))
def mlp_attention(query, key, value, w_q, w_k, v_w, valid_len=None, *,
                  tile_q=512, compute_dtype=None):
    """Additive attention.

    query: (B, Q, query_size)   key: (B, K, key_size)   value: (B, K, value_dim)
    w_q:   (query_size, units)  w_k: (key_size, units)  v_w:   (1, units)
      (weights stored transposed relative to nn.Linear so the kernel does x @ W)
    valid_len: None or int (B,) — number of valid key positions per batch.
    compute_dtype: e.g. jnp.bfloat16 to feed the MXU in bf16 on v6e/v7x (f32 accumulate).
    """
    B, Q, q_size = query.shape
    _, K, k_size = key.shape
    _, _, v_dim = value.shape
    U = w_q.shape[1]
    out_dtype = query.dtype

    # ---- lane-dense output padding; skipped when already a multiple of 128 ------------
    V_pad = v_dim if v_dim % 128 == 0 else _round_up(v_dim, 128)
    # ---- units padded only to the sublane quantum (score loop runs over the true U) ---
    U_feat = _round_up(U, 8)

    cdt = compute_dtype if compute_dtype is not None else query.dtype
    elem = jnp.dtype(cdt).itemsize
    out_elem = jnp.dtype(out_dtype).itemsize

    # ---- per-generation VMEM budget (v7x: 64 MiB/TC; v5e/v6e: 128 MiB) ----------------
    try:
        vmem_cap = int(pltpu.get_tpu_info().vmem_capacity_bytes)
    except Exception:
        vmem_cap = 64 * 2**20                      # conservative (v7x per-TC)
    if vmem_cap <= 64 * 2**20:
        work_budget, limit_cap = 12 * 2**20, 40 * 2**20
    else:
        work_budget, limit_cap = 24 * 2**20, 64 * 2**20

    # ---- pick the query tile from the (now 2-D) working set; avoid padding Q if we can -
    row_bytes = (2 * q_size * elem                 # query tile (double-buffered)
                 + 2 * V_pad * out_elem            # output tile (double-buffered)
                 + U_feat * 4                      # qf
                 + 4 * K * 4)                      # scores / exp / weights temporaries
    fixed_bytes = (2 * K * (k_size + V_pad) * elem         # key + value blocks (x2 buffers)
                   + 2 * (q_size + k_size) * U_feat * elem  # projection weights (x2 buffers)
                   + U_feat * K * 4                          # kf scratch
                   + 64 * 1024)                              # slack
    q_rows = _round_up(Q, 8)
    avail = max(work_budget - fixed_bytes, 8 * row_bytes)
    tq_cap = max(8, (avail // row_bytes) // 8 * 8)
    tile_q = int(min(tile_q, tq_cap, q_rows))
    Q_pad = _round_up(Q, tile_q)

    # ---- padding (all zero padding is mathematically inert; skipped when not needed) ---
    q_p = query if Q_pad == Q else jnp.pad(query, ((0, 0), (0, Q_pad - Q), (0, 0)))
    v_p = value if V_pad == v_dim else jnp.pad(value, ((0, 0), (0, 0), (0, V_pad - v_dim)))
    wq_p = w_q if U_feat == U else jnp.pad(w_q, ((0, 0), (0, U_feat - U)))
    wk_p = w_k if U_feat == U else jnp.pad(w_k, ((0, 0), (0, U_feat - U)))
    wkt_p = wk_p.T                                  # (U_feat, k_size): kf built as (U, K)
    vv_p = v_w.reshape(U).astype(jnp.float32)       # SMEM; score math stays f32
    k_p = key

    if compute_dtype is not None:                   # bf16 MXU inputs (f32 accumulation)
        q_p = q_p.astype(compute_dtype)
        k_p = k_p.astype(compute_dtype)
        v_p = v_p.astype(compute_dtype)
        wq_p = wq_p.astype(compute_dtype)
        wkt_p = wkt_p.astype(compute_dtype)

    if valid_len is None:
        vl = jnp.full((B,), K, jnp.int32)
    else:
        if valid_len.ndim != 1:
            # TODO(synk): 2-D valid_len (per-query lengths) not supported in this kernel.
            raise NotImplementedError("only 1-D valid_len is supported")
        vl = valid_len.astype(jnp.int32)

    grid = (B, Q_pad // tile_q)

    # ---- cost estimate & VMEM limit (actual element sizes, softmax temps included) -----
    flops = 2 * B * (Q_pad * q_size * U_feat        # query projection
                     + K * k_size * U_feat          # key projection (once per batch)
                     + Q_pad * K * U                # score accumulation (mul+add per unit)
                     + Q_pad * K * V_pad)           # weights @ value
    transc = B * Q_pad * K * (U + 1)                # tanh per unit + exp
    bytes_accessed = int(q_p.size * q_p.dtype.itemsize + k_p.size * k_p.dtype.itemsize
                         + v_p.size * v_p.dtype.itemsize
                         + wq_p.size * wq_p.dtype.itemsize
                         + wkt_p.size * wkt_p.dtype.itemsize
                         + vv_p.size * 4
                         + B * Q_pad * V_pad * out_elem)
    step_bytes = fixed_bytes + tile_q * row_bytes
    vmem_limit = int(min(limit_cap, max(16 * 2**20, 2 * step_bytes)))

    kernel = functools.partial(_mlp_attn_kernel, units=U)

    out_p = pl.pallas_call(
        kernel,
        out_shape=jax.ShapeDtypeStruct((B, Q_pad, V_pad), out_dtype),
        grid_spec=pltpu.PrefetchScalarGridSpec(
            num_scalar_prefetch=1,
            grid=grid,
            in_specs=[
                pl.BlockSpec((1, tile_q, q_size), lambda b, qi, vl: (b, qi, 0)),
                # K/V and weights: block index is constant along the inner qi axis, so the
                # resident copies are reused (no re-DMA); default double-buffering is kept
                # so the next batch's K/V prefetch overlaps the last query tile (footprint
                # already charged to `fixed_bytes`).
                pl.BlockSpec((1, K, k_size),      lambda b, qi, vl: (b, 0, 0)),
                pl.BlockSpec((1, K, V_pad),       lambda b, qi, vl: (b, 0, 0)),
                pl.BlockSpec((q_size, U_feat),    lambda b, qi, vl: (0, 0)),
                pl.BlockSpec((U_feat, k_size),    lambda b, qi, vl: (0, 0)),
                pl.BlockSpec(memory_space=pltpu.MemorySpace.SMEM),   # v weights -> SMEM
            ],
            out_specs=pl.BlockSpec((1, tile_q, V_pad), lambda b, qi, vl: (b, qi, 0)),
            scratch_shapes=[pltpu.VMEM((U_feat, K), jnp.float32)],
        ),
        compiler_params=pltpu.CompilerParams(
            # batch axis is parallel (megacore); the query-tile axis carries the per-batch
            # kf scratch (written at qi == 0), so it must stay "arbitrary".
            dimension_semantics=("parallel", "arbitrary"),
            vmem_limit_bytes=vmem_limit),
        cost_estimate=pl.CostEstimate(flops=flops, transcendentals=transc,
                                      bytes_accessed=bytes_accessed),
    )(vl, q_p, k_p, v_p, wq_p, wkt_p, vv_p)

    if Q_pad != Q or V_pad != v_dim:
        return out_p[:, :Q, :v_dim]
    return out_p


def _init_linear_weight(key, fan_in, fan_out, dtype=jnp.float32):
    """torch.nn.Linear default init, stored transposed as (fan_in, fan_out)."""
    bound = 1.0 / math.sqrt(fan_in)
    return jax.random.uniform(key, (fan_in, fan_out), dtype, -bound, bound)


if __name__ == "__main__":
    batch, num_q, num_kv = 2, 8, 16
    query_size, key_size, units, value_dim = 32, 32, 32, 32

    root = jax.random.PRNGKey(0)
    kq, kk, kv, k1, k2, k3 = jax.random.split(root, 6)

    query = jax.random.normal(kq, (batch, num_q, query_size), jnp.float32)
    key_ = jax.random.normal(kk, (batch, num_kv, key_size), jnp.float32)
    value = jax.random.normal(kv, (batch, num_kv, value_dim), jnp.float32)

    w_q = _init_linear_weight(k1, query_size, units)
    w_k = _init_linear_weight(k2, key_size, units)
    v_w = _init_linear_weight(k3, units, 1).T          # (1, units)

    valid_len = jnp.array([9, 16], jnp.int32)

    compute_dtype = None   # set jnp.bfloat16 on v6e/v7x for bf16 MXU inputs
    out = mlp_attention(query, key_, value, w_q, w_k, v_w, valid_len,
                        compute_dtype=compute_dtype)
    out = jax.block_until_ready(out)

    # Pure-JAX reference (same math as the PyTorch module; dropout in eval mode = identity).
    qf = jnp.einsum("bqd,du->bqu", query, w_q, precision="highest")
    kf = jnp.einsum("bkd,du->bku", key_, w_k, precision="highest")
    feat = jnp.tanh(qf[:, :, None, :] + kf[:, None, :, :])
    scores = jnp.einsum("bqku,u->bqk", feat, v_w[0], precision="highest")
    ids = jnp.arange(num_kv)[None, None, :]
    scores = jnp.where(ids < valid_len[:, None, None], scores, -1e6)
    weights = jax.nn.softmax(scores, axis=-1)
    ref = jnp.einsum("bqk,bkd->bqd", weights, value, precision="highest")

    assert out.shape == (batch, num_q, value_dim)
    max_err = float(jnp.max(jnp.abs(out - ref)))
    # tolerance gated on compute_dtype (bf16 MXU inputs) and the approx-reciprocal softmax.
    tol = 2e-2 if compute_dtype is not None else 2e-3
    assert jnp.allclose(out, ref, atol=tol, rtol=tol), f"max_err={max_err}"

    print("KERNEL_OK")
</pallas_src>

<mosaic_0001>
module attributes {stable_mosaic.version = 11 : i64} {
  func.func @_mlp_attn_kernel(%arg0: i32, %arg1: i32, %arg2: memref<2xi32, #tpu.memory_space<smem>>, %arg3: memref<1x8x32xf32, #tpu.memory_space<vmem>>, %arg4: memref<1x16x32xf32, #tpu.memory_space<vmem>>, %arg5: memref<1x16x128xf32, #tpu.memory_space<vmem>>, %arg6: memref<32x32xf32, #tpu.memory_space<vmem>>, %arg7: memref<32x32xf32, #tpu.memory_space<vmem>>, %arg8: memref<32xf32, #tpu.memory_space<smem>>, %arg9: memref<1x8x128xf32, #tpu.memory_space<vmem>>, %arg10: memref<32x16xf32, #tpu.memory_space<vmem>>) attributes {dimension_semantics = [#tpu.dimension_semantics<parallel>, #tpu.dimension_semantics<arbitrary>], iteration_bounds = array<i64: 2, 1>, scalar_prefetch = 1 : i64, scratch_operands = 1 : i64, tpu.core_type = #tpu.core_type<tc>, window_params = [{transform_indices = @transform_0, window_bounds = array<i64: 1, 8, 32>}, {transform_indices = @transform_1, window_bounds = array<i64: 1, 16, 32>}, {transform_indices = @transform_2, window_bounds = array<i64: 1, 16, 128>}, {pipeline_mode = #tpu.pipeline_mode<synchronous>, transform_indices = @transform_3, window_bounds = array<i64: 32, 32>}, {pipeline_mode = #tpu.pipeline_mode<synchronous>, transform_indices = @transform_4, window_bounds = array<i64: 32, 32>}, {transform_indices = @transform_5, window_bounds = array<i64: 32>}, {transform_indices = @transform_6, window_bounds = array<i64: 1, 8, 128>}]} {
    %c0_i32 = arith.constant 0 : i32
    %0 = arith.cmpi eq, %arg1, %c0_i32 : i32
    %1 = arith.extui %0 : i1 to i32
    %c0_i32_0 = arith.constant 0 : i32
    %2 = arith.cmpi ne, %1, %c0_i32_0 : i32
    scf.if %2 {
      %c0_81 = arith.constant 0 : index
      %c0_82 = arith.constant 0 : index
      %351 = vector.load %arg7[%c0_81, %c0_82] : memref<32x32xf32, #tpu.memory_space<vmem>>, vector<32x32xf32>
      %c0_83 = arith.constant 0 : index
      %c0_84 = arith.constant 0 : index
      %c0_85 = arith.constant 0 : index
      %352 = vector.load %arg4[%c0_83, %c0_84, %c0_85] : memref<1x16x32xf32, #tpu.memory_space<vmem>>, vector<1x16x32xf32>
      %353 = vector.shape_cast %352 : vector<1x16x32xf32> to vector<16x32xf32>
      %354 = tpu.transpose %353, [1, 0] : vector<16x32xf32> -> vector<32x16xf32>
      %cst_86 = arith.constant dense<0.000000e+00> : vector<32x16xf32>
      %355 = tpu.matmul %351, %354, %cst_86 {dimension_numbers = #tpu.dot_dimension_numbers<[1], [0], [0], [1], [0, 0, 1, 1], [], []>} : vector<32x32xf32>, vector<32x16xf32>, vector<32x16xf32> -> vector<32x16xf32>
      %c0_87 = arith.constant 0 : index
      %c0_88 = arith.constant 0 : index
      %356 = vector.load %arg10[%c0_87, %c0_88] : memref<32x16xf32, #tpu.memory_space<vmem>>, vector<32x16xf32>
      tpu.vector_store %arg10[%c0_87, %c0_88], %355 {strides = array<i32>} : memref<32x16xf32, #tpu.memory_space<vmem>>, vector<32x16xf32>,
    } else {
    }
    %c0 = arith.constant 0 : index
    %c0_1 = arith.constant 0 : index
    %c0_2 = arith.constant 0 : index
    %3 = vector.load %arg3[%c0, %c0_1, %c0_2] : memref<1x8x32xf32, #tpu.memory_space<vmem>>, vector<1x8x32xf32>
    %4 = vector.shape_cast %3 : vector<1x8x32xf32> to vector<8x32xf32>
    %c0_3 = arith.constant 0 : index
    %c0_4 = arith.constant 0 : index
    %5 = vector.load %arg6[%c0_3, %c0_4] : memref<32x32xf32, #tpu.memory_space<vmem>>, vector<32x32xf32>
    %cst = arith.constant dense<0.000000e+00> : vector<8x32xf32>
    %6 = tpu.matmul %4, %5, %cst {dimension_numbers = #tpu.dot_dimension_numbers<[1], [0], [0], [1], [0, 0, 1, 1], [], []>} : vector<8x32xf32>, vector<32x32xf32>, vector<8x32xf32> -> vector<8x32xf32>
    %cst_5 = arith.constant 0.000000e+00 : f32
    %7 = vector.broadcast %cst_5 : f32 to vector<8x16xf32>
    %8 = vector.extract_strided_slice %6 {offsets = [0, 0], sizes = [8, 1], strides = [1, 1]} : vector<8x32xf32> to vector<8x1xf32>
    %c0_6 = arith.constant 0 : index
    %c0_7 = arith.constant 0 : index
    %9 = vector.load %arg10[%c0_6, %c0_7] : memref<32x16xf32, #tpu.memory_space<vmem>>, vector<1x16xf32>
    %c0_8 = arith.constant 0 : index
    %10 = memref.load %arg8[%c0_8] : memref<32xf32, #tpu.memory_space<smem>>
    %11 = vector.broadcast %8 : vector<8x1xf32> to vector<8x16xf32>
    %12 = vector.broadcast %9 : vector<1x16xf32> to vector<8x16xf32>
    %13 = arith.addf %11, %12 : vector<8x16xf32>
    %14 = math.tanh %13 : vector<8x16xf32>
    %15 = vector.broadcast %10 : f32 to vector<8x16xf32>
    %16 = arith.mulf %15, %14 : vector<8x16xf32>
    %17 = arith.addf %7, %16 : vector<8x16xf32>
    %18 = vector.extract_strided_slice %6 {offsets = [0, 1], sizes = [8, 1], strides = [1, 1]} : vector<8x32xf32> to vector<8x1xf32>
    %c1 = arith.constant 1 : index
    %c0_9 = arith.constant 0 : index
    %19 = vector.load %arg10[%c1, %c0_9] : memref<32x16xf32, #tpu.memory_space<vmem>>, vector<1x16xf32>
    %c1_10 = arith.constant 1 : index
    %20 = memref.load %arg8[%c1_10] : memref<32xf32, #tpu.memory_space<smem>>
    %21 = vector.broadcast %18 : vector<8x1xf32> to vector<8x16xf32>
    %22 = vector.broadcast %19 : vector<1x16xf32> to vector<8x16xf32>
    %23 = arith.addf %21, %22 : vector<8x16xf32>
    %24 = math.tanh %23 : vector<8x16xf32>
    %25 = vector.broadcast %20 : f32 to vector<8x16xf32>
    %26 = arith.mulf %25, %24 : vector<8x16xf32>
    %27 = arith.addf %17, %26 : vector<8x16xf32>
    %28 = vector.extract_strided_slice %6 {offsets = [0, 2], sizes = [8, 1], strides = [1, 1]} : vector<8x32xf32> to vector<8x1xf32>
    %c2 = arith.constant 2 : index
    %c0_11 = arith.constant 0 : index
    %29 = vector.load %arg10[%c2, %c0_11] : memref<32x16xf32, #tpu.memory_space<vmem>>, vector<1x16xf32>
    %c2_12 = arith.constant 2 : index
    %30 = memref.load %arg8[%c2_12] : memref<32xf32, #tpu.memory_space<smem>>
    %31 = vector.broadcast %28 : vector<8x1xf32> to vector<8x16xf32>
    %32 = vector.broadcast %29 : vector<1x16xf32> to vector<8x16xf32>
    %33 = arith.addf %31, %32 : vector<8x16xf32>
    %34 = math.tanh %33 : vector<8x16xf32>
    %35 = vector.broadcast %30 : f32 to vector<8x16xf32>
    %36 = arith.mulf %35, %34 : vector<8x16xf32>
    %37 = arith.addf %27, %36 : vector<8x16xf32>
    %38 = vector.extract_strided_slice %6 {offsets = [0, 3], sizes = [8, 1], strides = [1, 1]} : vector<8x32xf32> to vector<8x1xf32>
    %c3 = arith.constant 3 : index
    %c0_13 = arith.constant 0 : index
    %39 = vector.load %arg10[%c3, %c0_13] : memref<32x16xf32, #tpu.memory_space<vmem>>, vector<1x16xf32>
    %c3_14 = arith.constant 3 : index
    %40 = memref.load %arg8[%c3_14] : memref<32xf32, #tpu.memory_space<smem>>
    %41 = vector.broadcast %38 : vector<8x1xf32> to vector<8x16xf32>
    %42 = vector.broadcast %39 : vector<1x16xf32> to vector<8x16xf32>
    %43 = arith.addf %41, %42 : vector<8x16xf32>
    %44 = math.tanh %43 : vector<8x16xf32>
    %45 = vector.broadcast %40 : f32 to vector<8x16xf32>
    %46 = arith.mulf %45, %44 : vector<8x16xf32>
    %47 = arith.addf %37, %46 : vector<8x16xf32>
    %48 = vector.extract_strided_slice %6 {offsets = [0, 4], sizes = [8, 1], strides = [1, 1]} : vector<8x32xf32> to vector<8x1xf32>
    %c4 = arith.constant 4 : index
    %c0_15 = arith.constant 0 : index
    %49 = vector.load %arg10[%c4, %c0_15] : memref<32x16xf32, #tpu.memory_space<vmem>>, vector<1x16xf32>
    %c4_16 = arith.constant 4 : index
    %50 = memref.load %arg8[%c4_16] : memref<32xf32, #tpu.memory_space<smem>>
    %51 = vector.broadcast %48 : vector<8x1xf32> to vector<8x16xf32>
    %52 = vector.broadcast %49 : vector<1x16xf32> to vector<8x16xf32>
    %53 = arith.addf %51, %52 : vector<8x16xf32>
    %54 = math.tanh %53 : vector<8x16xf32>
    %55 = vector.broadcast %50 : f32 to vector<8x16xf32>
    %56 = arith.mulf %55, %54 : vector<8x16xf32>
    %57 = arith.addf %47, %56 : vector<8x16xf32>
    %58 = vector.extract_strided_slice %6 {offsets = [0, 5], sizes = [8, 1], strides = [1, 1]} : vector<8x32xf32> to vector<8x1xf32>
    %c5 = arith.constant 5 : index
    %c0_17 = arith.constant 0 : index
    %59 = vector.load %arg10[%c5, %c0_17] : memref<32x16xf32, #tpu.memory_space<vmem>>, vector<1x16xf32>
    %c5_18 = arith.constant 5 : index
    %60 = memref.load %arg8[%c5_18] : memref<32xf32, #tpu.memory_space<smem>>
    %61 = vector.broadcast %58 : vector<8x1xf32> to vector<8x16xf32>
    %62 = vector.broadcast %59 : vector<1x16xf32> to vector<8x16xf32>
    %63 = arith.addf %61, %62 : vector<8x16xf32>
    %64 = math.tanh %63 : vector<8x16xf32>
    %65 = vector.broadcast %60 : f32 to vector<8x16xf32>
    %66 = arith.mulf %65, %64 : vector<8x16xf32>
    %67 = arith.addf %57, %66 : vector<8x16xf32>
    %68 = vector.extract_strided_slice %6 {offsets = [0, 6], sizes = [8, 1], strides = [1, 1]} : vector<8x32xf32> to vector<8x1xf32>
    %c6 = arith.constant 6 : index
    %c0_19 = arith.constant 0 : index
    %69 = vector.load %arg10[%c6, %c0_19] : memref<32x16xf32, #tpu.memory_space<vmem>>, vector<1x16xf32>
    %c6_20 = arith.constant 6 : index
    %70 = memref.load %arg8[%c6_20] : memref<32xf32, #tpu.memory_space<smem>>
    %71 = vector.broadcast %68 : vector<8x1xf32> to vector<8x16xf32>
    %72 = vector.broadcast %69 : vector<1x16xf32> to vector<8x16xf32>
    %73 = arith.addf %71, %72 : vector<8x16xf32>
    %74 = math.tanh %73 : vector<8x16xf32>
    %75 = vector.broadcast %70 : f32 to vector<8x16xf32>
    %76 = arith.mulf %75, %74 : vector<8x16xf32>
    %77 = arith.addf %67, %76 : vector<8x16xf32>
    %78 = vector.extract_strided_slice %6 {offsets = [0, 7], sizes = [8, 1], strides = [1, 1]} : vector<8x32xf32> to vector<8x1xf32>
    %c7 = arith.constant 7 : index
    %c0_21 = arith.constant 0 : index
    %79 = vector.load %arg10[%c7, %c0_21] : memref<32x16xf32, #tpu.memory_space<vmem>>, vector<1x16xf32>
    %c7_22 = arith.constant 7 : index
    %80 = memref.load %arg8[%c7_22] : memref<32xf32, #tpu.memory_space<smem>>
    %81 = vector.broadcast %78 : vector<8x1xf32> to vector<8x16xf32>
    %82 = vector.broadcast %79 : vector<1x16xf32> to vector<8x16xf32>
    %83 = arith.addf %81, %82 : vector<8x16xf32>
    %84 = math.tanh %83 : vector<8x16xf32>
    %85 = vector.broadcast %80 : f32 to vector<8x16xf32>
    %86 = arith.mulf %85, %84 : vector<8x16xf32>
    %87 = arith.addf %77, %86 : vector<8x16xf32>
    %88 = vector.extract_strided_slice %6 {offsets = [0, 8], sizes = [8, 1], strides = [1, 1]} : vector<8x32xf32> to vector<8x1xf32>
    %c8 = arith.constant 8 : index
    %c0_23 = arith.constant 0 : index
    %89 = vector.load %arg10[%c8, %c0_23] : memref<32x16xf32, #tpu.memory_space<vmem>>, vector<1x16xf32>
    %c8_24 = arith.constant 8 : index
    %90 = memref.load %arg8[%c8_24] : memref<32xf32, #tpu.memory_space<smem>>
    %91 = vector.broadcast %88 : vector<8x1xf32> to vector<8x16xf32>
    %92 = vector.broadcast %89 : vector<1x16xf32> to vector<8x16xf32>
    %93 = arith.addf %91, %92 : vector<8x16xf32>
    %94 = math.tanh %93 : vector<8x16xf32>
    %95 = vector.broadcast %90 : f32 to vector<8x16xf32>
    %96 = arith.mulf %95, %94 : vector<8x16xf32>
    %97 = arith.addf %87, %96 : vector<8x16xf32>
    %98 = vector.extract_strided_slice %6 {offsets = [0, 9], sizes = [8, 1], strides = [1, 1]} : vector<8x32xf32> to vector<8x1xf32>
    %c9 = arith.constant 9 : index
    %c0_25 = arith.constant 0 : index
    %99 = vector.load %arg10[%c9, %c0_25] : memref<32x16xf32, #tpu.memory_space<vmem>>, vector<1x16xf32>
    %c9_26 = arith.constant 9 : index
    %100 = memref.load %arg8[%c9_26] : memref<32xf32, #tpu.memory_space<smem>>
    %101 = vector.broadcast %98 : vector<8x1xf32> to vector<8x16xf32>
    %102 = vector.broadcast %99 : vector<1x16xf32> to vector<8x16xf32>
    %103 = arith.addf %101, %102 : vector<8x16xf32>
    %104 = math.tanh %103 : vector<8x16xf32>
    %105 = vector.broadcast %100 : f32 to vector<8x16xf32>
    %106 = arith.mulf %105, %104 : vector<8x16xf32>
    %107 = arith.addf %97, %106 : vector<8x16xf32>
    %108 = vector.extract_strided_slice %6 {offsets = [0, 10], sizes = [8, 1], strides = [1, 1]} : vector<8x32xf32> to vector<8x1xf32>
    %c10 = arith.constant 10 : index
    %c0_27 = arith.constant 0 : index
    %109 = vector.load %arg10[%c10, %c0_27] : memref<32x16xf32, #tpu.memory_space<vmem>>, vector<1x16xf32>
    %c10_28 = arith.constant 10 : index
    %110 = memref.load %arg8[%c10_28] : memref<32xf32, #tpu.memory_space<smem>>
    %111 = vector.broadcast %108 : vector<8x1xf32> to vector<8x16xf32>
    %112 = vector.broadcast %109 : vector<1x16xf32> to vector<8x16xf32>
    %113 = arith.addf %111, %112 : vector<8x16xf32>
    %114 = math.tanh %113 : vector<8x16xf32>
    %115 = vector.broadcast %110 : f32 to vector<8x16xf32>
    %116 = arith.mulf %115, %114 : vector<8x16xf32>
    %117 = arith.addf %107, %116 : vector<8x16xf32>
    %118 = vector.extract_strided_slice %6 {offsets = [0, 11], sizes = [8, 1], strides = [1, 1]} : vector<8x32xf32> to vector<8x1xf32>
    %c11 = arith.constant 11 : index
    %c0_29 = arith.constant 0 : index
    %119 = vector.load %arg10[%c11, %c0_29] : memref<32x16xf32, #tpu.memory_space<vmem>>, vector<1x16xf32>
    %c11_30 = arith.constant 11 : index
    %120 = memref.load %arg8[%c11_30] : memref<32xf32, #tpu.memory_space<smem>>
    %121 = vector.broadcast %118 : vector<8x1xf32> to vector<8x16xf32>
    %122 = vector.broadcast %119 : vector<1x16xf32> to vector<8x16xf32>
    %123 = arith.addf %121, %122 : vector<8x16xf32>
    %124 = math.tanh %123 : vector<8x16xf32>
    %125 = vector.broadcast %120 : f32 to vector<8x16xf32>
    %126 = arith.mulf %125, %124 : vector<8x16xf32>
    %127 = arith.addf %117, %126 : vector<8x16xf32>
    %128 = vector.extract_strided_slice %6 {offsets = [0, 12], sizes = [8, 1], strides = [1, 1]} : vector<8x32xf32> to vector<8x1xf32>
    %c12 = arith.constant 12 : index
    %c0_31 = arith.constant 0 : index
    %129 = vector.load %arg10[%c12, %c0_31] : memref<32x16xf32, #tpu.memory_space<vmem>>, vector<1x16xf32>
    %c12_32 = arith.constant 12 : index
    %130 = memref.load %arg8[%c12_32] : memref<32xf32, #tpu.memory_space<smem>>
    %131 = vector.broadcast %128 : vector<8x1xf32> to vector<8x16xf32>
    %132 = vector.broadcast %129 : vector<1x16xf32> to vector<8x16xf32>
    %133 = arith.addf %131, %132 : vector<8x16xf32>
    %134 = math.tanh %133 : vector<8x16xf32>
    %135 = vector.broadcast %130 : f32 to vector<8x16xf32>
    %136 = arith.mulf %135, %134 : vector<8x16xf32>
    %137 = arith.addf %127, %136 : vector<8x16xf32>
    %138 = vector.extract_strided_slice %6 {offsets = [0, 13], sizes = [8, 1], strides = [1, 1]} : vector<8x32xf32> to vector<8x1xf32>
    %c13 = arith.constant 13 : index
    %c0_33 = arith.constant 0 : index
    %139 = vector.load %arg10[%c13, %c0_33] : memref<32x16xf32, #tpu.memory_space<vmem>>, vector<1x16xf32>
    %c13_34 = arith.constant 13 : index
    %140 = memref.load %arg8[%c13_34] : memref<32xf32, #tpu.memory_space<smem>>
    %141 = vector.broadcast %138 : vector<8x1xf32> to vector<8x16xf32>
    %142 = vector.broadcast %139 : vector<1x16xf32> to vector<8x16xf32>
    %143 = arith.addf %141, %142 : vector<8x16xf32>
    %144 = math.tanh %143 : vector<8x16xf32>
    %145 = vector.broadcast %140 : f32 to vector<8x16xf32>
    %146 = arith.mulf %145, %144 : vector<8x16xf32>
    %147 = arith.addf %137, %146 : vector<8x16xf32>
    %148 = vector.extract_strided_slice %6 {offsets = [0, 14], sizes = [8, 1], strides = [1, 1]} : vector<8x32xf32> to vector<8x1xf32>
    %c14 = arith.constant 14 : index
    %c0_35 = arith.constant 0 : index
    %149 = vector.load %arg10[%c14, %c0_35] : memref<32x16xf32, #tpu.memory_space<vmem>>, vector<1x16xf32>
    %c14_36 = arith.constant 14 : index
    %150 = memref.load %arg8[%c14_36] : memref<32xf32, #tpu.memory_space<smem>>
    %151 = vector.broadcast %148 : vector<8x1xf32> to vector<8x16xf32>
    %152 = vector.broadcast %149 : vector<1x16xf32> to vector<8x16xf32>
    %153 = arith.addf %151, %152 : vector<8x16xf32>
    %154 = math.tanh %153 : vector<8x16xf32>
    %155 = vector.broadcast %150 : f32 to vector<8x16xf32>
    %156 = arith.mulf %155, %154 : vector<8x16xf32>
    %157 = arith.addf %147, %156 : vector<8x16xf32>
    %158 = vector.extract_strided_slice %6 {offsets = [0, 15], sizes = [8, 1], strides = [1, 1]} : vector<8x32xf32> to vector<8x1xf32>
    %c15 = arith.constant 15 : index
    %c0_37 = arith.constant 0 : index
    %159 = vector.load %arg10[%c15, %c0_37] : memref<32x16xf32, #tpu.memory_space<vmem>>, vector<1x16xf32>
    %c15_38 = arith.constant 15 : index
    %160 = memref.load %arg8[%c15_38] : memref<32xf32, #tpu.memory_space<smem>>
    %161 = vector.broadcast %158 : vector<8x1xf32> to vector<8x16xf32>
    %162 = vector.broadcast %159 : vector<1x16xf32> to vector<8x16xf32>
    %163 = arith.addf %161, %162 : vector<8x16xf32>
    %164 = math.tanh %163 : vector<8x16xf32>
    %165 = vector.broadcast %160 : f32 to vector<8x16xf32>
    %166 = arith.mulf %165, %164 : vector<8x16xf32>
    %167 = arith.addf %157, %166 : vector<8x16xf32>
    %168 = vector.extract_strided_slice %6 {offsets = [0, 16], sizes = [8, 1], strides = [1, 1]} : vector<8x32xf32> to vector<8x1xf32>
    %c16 = arith.constant 16 : index
    %c0_39 = arith.constant 0 : index
    %169 = vector.load %arg10[%c16, %c0_39] : memref<32x16xf32, #tpu.memory_space<vmem>>, vector<1x16xf32>
    %c16_40 = arith.constant 16 : index
    %170 = memref.load %arg8[%c16_40] : memref<32xf32, #tpu.memory_space<smem>>
    %171 = vector.broadcast %168 : vector<8x1xf32> to vector<8x16xf32>
    %172 = vector.broadcast %169 : vector<1x16xf32> to vector<8x16xf32>
    %173 = arith.addf %171, %172 : vector<8x16xf32>
    %174 = math.tanh %173 : vector<8x16xf32>
    %175 = vector.broadcast %170 : f32 to vector<8x16xf32>
    %176 = arith.mulf %175, %174 : vector<8x16xf32>
    %177 = arith.addf %167, %176 : vector<8x16xf32>
    %178 = vector.extract_strided_slice %6 {offsets = [0, 17], sizes = [8, 1], strides = [1, 1]} : vector<8x32xf32> to vector<8x1xf32>
    %c17 = arith.constant 17 : index
    %c0_41 = arith.constant 0 : index
    %179 = vector.load %arg10[%c17, %c0_41] : memref<32x16xf32, #tpu.memory_space<vmem>>, vector<1x16xf32>
    %c17_42 = arith.constant 17 : index
    %180 = memref.load %arg8[%c17_42] : memref<32xf32, #tpu.memory_space<smem>>
    %181 = vector.broadcast %178 : vector<8x1xf32> to vector<8x16xf32>
    %182 = vector.broadcast %179 : vector<1x16xf32> to vector<8x16xf32>
    %183 = arith.addf %181, %182 : vector<8x16xf32>
    %184 = math.tanh %183 : vector<8x16xf32>
    %185 = vector.broadcast %180 : f32 to vector<8x16xf32>
    %186 = arith.mulf %185, %184 : vector<8x16xf32>
    %187 = arith.addf %177, %186 : vector<8x16xf32>
    %188 = vector.extract_strided_slice %6 {offsets = [0, 18], sizes = [8, 1], strides = [1, 1]} : vector<8x32xf32> to vector<8x1xf32>
    %c18 = arith.constant 18 : index
    %c0_43 = arith.constant 0 : index
    %189 = vector.load %arg10[%c18, %c0_43] : memref<32x16xf32, #tpu.memory_space<vmem>>, vector<1x16xf32>
    %c18_44 = arith.constant 18 : index
    %190 = memref.load %arg8[%c18_44] : memref<32xf32, #tpu.memory_space<smem>>
    %191 = vector.broadcast %188 : vector<8x1xf32> to vector<8x16xf32>
    %192 = vector.broadcast %189 : vector<1x16xf32> to vector<8x16xf32>
    %193 = arith.addf %191, %192 : vector<8x16xf32>
    %194 = math.tanh %193 : vector<8x16xf32>
    %195 = vector.broadcast %190 : f32 to vector<8x16xf32>
    %196 = arith.mulf %195, %194 : vector<8x16xf32>
    %197 = arith.addf %187, %196 : vector<8x16xf32>
    %198 = vector.extract_strided_slice %6 {offsets = [0, 19], sizes = [8, 1], strides = [1, 1]} : vector<8x32xf32> to vector<8x1xf32>
    %c19 = arith.constant 19 : index
    %c0_45 = arith.constant 0 : index
    %199 = vector.load %arg10[%c19, %c0_45] : memref<32x16xf32, #tpu.memory_space<vmem>>, vector<1x16xf32>
    %c19_46 = arith.constant 19 : index
    %200 = memref.load %arg8[%c19_46] : memref<32xf32, #tpu.memory_space<smem>>
    %201 = vector.broadcast %198 : vector<8x1xf32> to vector<8x16xf32>
    %202 = vector.broadcast %199 : vector<1x16xf32> to vector<8x16xf32>
    %203 = arith.addf %201, %202 : vector<8x16xf32>
    %204 = math.tanh %203 : vector<8x16xf32>
    %205 = vector.broadcast %200 : f32 to vector<8x16xf32>
    %206 = arith.mulf %205, %204 : vector<8x16xf32>
    %207 = arith.addf %197, %206 : vector<8x16xf32>
    %208 = vector.extract_strided_slice %6 {offsets = [0, 20], sizes = [8, 1], strides = [1, 1]} : vector<8x32xf32> to vector<8x1xf32>
    %c20 = arith.constant 20 : index
    %c0_47 = arith.constant 0 : index
    %209 = vector.load %arg10[%c20, %c0_47] : memref<32x16xf32, #tpu.memory_space<vmem>>, vector<1x16xf32>
    %c20_48 = arith.constant 20 : index
    %210 = memref.load %arg8[%c20_48] : memref<32xf32, #tpu.memory_space<smem>>
    %211 = vector.broadcast %208 : vector<8x1xf32> to vector<8x16xf32>
    %212 = vector.broadcast %209 : vector<1x16xf32> to vector<8x16xf32>
    %213 = arith.addf %211, %212 : vector<8x16xf32>
    %214 = math.tanh %213 : vector<8x16xf32>
    %215 = vector.broadcast %210 : f32 to vector<8x16xf32>
    %216 = arith.mulf %215, %214 : vector<8x16xf32>
    %217 = arith.addf %207, %216 : vector<8x16xf32>
    %218 = vector.extract_strided_slice %6 {offsets = [0, 21], sizes = [8, 1], strides = [1, 1]} : vector<8x32xf32> to vector<8x1xf32>
    %c21 = arith.constant 21 : index
    %c0_49 = arith.constant 0 : index
    %219 = vector.load %arg10[%c21, %c0_49] : memref<32x16xf32, #tpu.memory_space<vmem>>, vector<1x16xf32>
    %c21_50 = arith.constant 21 : index
    %220 = memref.load %arg8[%c21_50] : memref<32xf32, #tpu.memory_space<smem>>
    %221 = vector.broadcast %218 : vector<8x1xf32> to vector<8x16xf32>
    %222 = vector.broadcast %219 : vector<1x16xf32> to vector<8x16xf32>
    %223 = arith.addf %221, %222 : vector<8x16xf32>
    %224 = math.tanh %223 : vector<8x16xf32>
    %225 = vector.broadcast %220 : f32 to vector<8x16xf32>
    %226 = arith.mulf %225, %224 : vector<8x16xf32>
    %227 = arith.addf %217, %226 : vector<8x16xf32>
    %228 = vector.extract_strided_slice %6 {offsets = [0, 22], sizes = [8, 1], strides = [1, 1]} : vector<8x32xf32> to vector<8x1xf32>
    %c22 = arith.constant 22 : index
    %c0_51 = arith.constant 0 : index
    %229 = vector.load %arg10[%c22, %c0_51] : memref<32x16xf32, #tpu.memory_space<vmem>>, vector<1x16xf32>
    %c22_52 = arith.constant 22 : index
    %230 = memref.load %arg8[%c22_52] : memref<32xf32, #tpu.memory_space<smem>>
    %231 = vector.broadcast %228 : vector<8x1xf32> to vector<8x16xf32>
    %232 = vector.broadcast %229 : vector<1x16xf32> to vector<8x16xf32>
    %233 = arith.addf %231, %232 : vector<8x16xf32>
    %234 = math.tanh %233 : vector<8x16xf32>
    %235 = vector.broadcast %230 : f32 to vector<8x16xf32>
    %236 = arith.mulf %235, %234 : vector<8x16xf32>
    %237 = arith.addf %227, %236 : vector<8x16xf32>
    %238 = vector.extract_strided_slice %6 {offsets = [0, 23], sizes = [8, 1], strides = [1, 1]} : vector<8x32xf32> to vector<8x1xf32>
    %c23 = arith.constant 23 : index
    %c0_53 = arith.constant 0 : index
    %239 = vector.load %arg10[%c23, %c0_53] : memref<32x16xf32, #tpu.memory_space<vmem>>, vector<1x16xf32>
    %c23_54 = arith.constant 23 : index
    %240 = memref.load %arg8[%c23_54] : memref<32xf32, #tpu.memory_space<smem>>
    %241 = vector.broadcast %238 : vector<8x1xf32> to vector<8x16xf32>
    %242 = vector.broadcast %239 : vector<1x16xf32> to vector<8x16xf32>
    %243 = arith.addf %241, %242 : vector<8x16xf32>
    %244 = math.tanh %243 : vector<8x16xf32>
    %245 = vector.broadcast %240 : f32 to vector<8x16xf32>
    %246 = arith.mulf %245, %244 : vector<8x16xf32>
    %247 = arith.addf %237, %246 : vector<8x16xf32>
    %248 = vector.extract_strided_slice %6 {offsets = [0, 24], sizes = [8, 1], strides = [1, 1]} : vector<8x32xf32> to vector<8x1xf32>
    %c24 = arith.constant 24 : index
    %c0_55 = arith.constant 0 : index
    %249 = vector.load %arg10[%c24, %c0_55] : memref<32x16xf32, #tpu.memory_space<vmem>>, vector<1x16xf32>
    %c24_56 = arith.constant 24 : index
    %250 = memref.load %arg8[%c24_56] : memref<32xf32, #tpu.memory_space<smem>>
    %251 = vector.broadcast %248 : vector<8x1xf32> to vector<8x16xf32>
    %252 = vector.broadcast %249 : vector<1x16xf32> to vector<8x16xf32>
    %253 = arith.addf %251, %252 : vector<8x16xf32>
    %254 = math.tanh %253 : vector<8x16xf32>
    %255 = vector.broadcast %250 : f32 to vector<8x16xf32>
    %256 = arith.mulf %255, %254 : vector<8x16xf32>
    %257 = arith.addf %247, %256 : vector<8x16xf32>
    %258 = vector.extract_strided_slice %6 {offsets = [0, 25], sizes = [8, 1], strides = [1, 1]} : vector<8x32xf32> to vector<8x1xf32>
    %c25 = arith.constant 25 : index
    %c0_57 = arith.constant 0 : index
    %259 = vector.load %arg10[%c25, %c0_57] : memref<32x16xf32, #tpu.memory_space<vmem>>, vector<1x16xf32>
    %c25_58 = arith.constant 25 : index
    %260 = memref.load %arg8[%c25_58] : memref<32xf32, #tpu.memory_space<smem>>
    %261 = vector.broadcast %258 : vector<8x1xf32> to vector<8x16xf32>
    %262 = vector.broadcast %259 : vector<1x16xf32> to vector<8x16xf32>
    %263 = arith.addf %261, %262 : vector<8x16xf32>
    %264 = math.tanh %263 : vector<8x16xf32>
    %265 = vector.broadcast %260 : f32 to vector<8x16xf32>
    %266 = arith.mulf %265, %264 : vector<8x16xf32>
    %267 = arith.addf %257, %266 : vector<8x16xf32>
    %268 = vector.extract_strided_slice %6 {offsets = [0, 26], sizes = [8, 1], strides = [1, 1]} : vector<8x32xf32> to vector<8x1xf32>
    %c26 = arith.constant 26 : index
    %c0_59 = arith.constant 0 : index
    %269 = vector.load %arg10[%c26, %c0_59] : memref<32x16xf32, #tpu.memory_space<vmem>>, vector<1x16xf32>
    %c26_60 = arith.constant 26 : index
    %270 = memref.load %arg8[%c26_60] : memref<32xf32, #tpu.memory_space<smem>>
    %271 = vector.broadcast %268 : vector<8x1xf32> to vector<8x16xf32>
    %272 = vector.broadcast %269 : vector<1x16xf32> to vector<8x16xf32>
    %273 = arith.addf %271, %272 : vector<8x16xf32>
    %274 = math.tanh %273 : vector<8x16xf32>
    %275 = vector.broadcast %270 : f32 to vector<8x16xf32>
    %276 = arith.mulf %275, %274 : vector<8x16xf32>
    %277 = arith.addf %267, %276 : vector<8x16xf32>
    %278 = vector.extract_strided_slice %6 {offsets = [0, 27], sizes = [8, 1], strides = [1, 1]} : vector<8x32xf32> to vector<8x1xf32>
    %c27 = arith.constant 27 : index
    %c0_61 = arith.constant 0 : index
    %279 = vector.load %arg10[%c27, %c0_61] : memref<32x16xf32, #tpu.memory_space<vmem>>, vector<1x16xf32>
    %c27_62 = arith.constant 27 : index
    %280 = memref.load %arg8[%c27_62] : memref<32xf32, #tpu.memory_space<smem>>
    %281 = vector.broadcast %278 : vector<8x1xf32> to vector<8x16xf32>
    %282 = vector.broadcast %279 : vector<1x16xf32> to vector<8x16xf32>
    %283 = arith.addf %281, %282 : vector<8x16xf32>
    %284 = math.tanh %283 : vector<8x16xf32>
    %285 = vector.broadcast %280 : f32 to vector<8x16xf32>
    %286 = arith.mulf %285, %284 : vector<8x16xf32>
    %287 = arith.addf %277, %286 : vector<8x16xf32>
    %288 = vector.extract_strided_slice %6 {offsets = [0, 28], sizes = [8, 1], strides = [1, 1]} : vector<8x32xf32> to vector<8x1xf32>
    %c28 = arith.constant 28 : index
    %c0_63 = arith.constant 0 : index
    %289 = vector.load %arg10[%c28, %c0_63] : memref<32x16xf32, #tpu.memory_space<vmem>>, vector<1x16xf32>
    %c28_64 = arith.constant 28 : index
    %290 = memref.load %arg8[%c28_64] : memref<32xf32, #tpu.memory_space<smem>>
    %291 = vector.broadcast %288 : vector<8x1xf32> to vector<8x16xf32>
    %292 = vector.broadcast %289 : vector<1x16xf32> to vector<8x16xf32>
    %293 = arith.addf %291, %292 : vector<8x16xf32>
    %294 = math.tanh %293 : vector<8x16xf32>
    %295 = vector.broadcast %290 : f32 to vector<8x16xf32>
    %296 = arith.mulf %295, %294 : vector<8x16xf32>
    %297 = arith.addf %287, %296 : vector<8x16xf32>
    %298 = vector.extract_strided_slice %6 {offsets = [0, 29], sizes = [8, 1], strides = [1, 1]} : vector<8x32xf32> to vector<8x1xf32>
    %c29 = arith.constant 29 : index
    %c0_65 = arith.constant 0 : index
    %299 = vector.load %arg10[%c29, %c0_65] : memref<32x16xf32, #tpu.memory_space<vmem>>, vector<1x16xf32>
    %c29_66 = arith.constant 29 : index
    %300 = memref.load %arg8[%c29_66] : memref<32xf32, #tpu.memory_space<smem>>
    %301 = vector.broadcast %298 : vector<8x1xf32> to vector<8x16xf32>
    %302 = vector.broadcast %299 : vector<1x16xf32> to vector<8x16xf32>
    %303 = arith.addf %301, %302 : vector<8x16xf32>
    %304 = math.tanh %303 : vector<8x16xf32>
    %305 = vector.broadcast %300 : f32 to vector<8x16xf32>
    %306 = arith.mulf %305, %304 : vector<8x16xf32>
    %307 = arith.addf %297, %306 : vector<8x16xf32>
    %308 = vector.extract_strided_slice %6 {offsets = [0, 30], sizes = [8, 1], strides = [1, 1]} : vector<8x32xf32> to vector<8x1xf32>
    %c30 = arith.constant 30 : index
    %c0_67 = arith.constant 0 : index
    %309 = vector.load %arg10[%c30, %c0_67] : memref<32x16xf32, #tpu.memory_space<vmem>>, vector<1x16xf32>
    %c30_68 = arith.constant 30 : index
    %310 = memref.load %arg8[%c30_68] : memref<32xf32, #tpu.memory_space<smem>>
    %311 = vector.broadcast %308 : vector<8x1xf32> to vector<8x16xf32>
    %312 = vector.broadcast %309 : vector<1x16xf32> to vector<8x16xf32>
    %313 = arith.addf %311, %312 : vector<8x16xf32>
    %314 = math.tanh %313 : vector<8x16xf32>
    %315 = vector.broadcast %310 : f32 to vector<8x16xf32>
    %316 = arith.mulf %315, %314 : vector<8x16xf32>
    %317 = arith.addf %307, %316 : vector<8x16xf32>
    %318 = vector.extract_strided_slice %6 {offsets = [0, 31], sizes = [8, 1], strides = [1, 1]} : vector<8x32xf32> to vector<8x1xf32>
    %c31 = arith.constant 31 : index
    %c0_69 = arith.constant 0 : index
    %319 = vector.load %arg10[%c31, %c0_69] : memref<32x16xf32, #tpu.memory_space<vmem>>, vector<1x16xf32>
    %c31_70 = arith.constant 31 : index
    %320 = memref.load %arg8[%c31_70] : memref<32xf32, #tpu.memory_space<smem>>
    %321 = vector.broadcast %318 : vector<8x1xf32> to vector<8x16xf32>
    %322 = vector.broadcast %319 : vector<1x16xf32> to vector<8x16xf32>
    %323 = arith.addf %321, %322 : vector<8x16xf32>
    %324 = math.tanh %323 : vector<8x16xf32>
    %325 = vector.broadcast %320 : f32 to vector<8x16xf32>
    %326 = arith.mulf %325, %324 : vector<8x16xf32>
    %327 = arith.addf %317, %326 : vector<8x16xf32>
    %328 = tpu.iota {dimensions = array<i32: 1>} : vector<8x16xi32>
    %329 = arith.index_cast %arg0 : i32 to index
    %330 = memref.load %arg2[%329] : memref<2xi32, #tpu.memory_space<smem>>
    %331 = vector.broadcast %330 : i32 to vector<8x16xi32>
    %332 = arith.cmpi slt, %328, %331 : vector<8x16xi32>
    %cst_71 = arith.constant -1.000000e+06 : f32
    %333 = vector.broadcast %cst_71 : f32 to vector<8x16xf32>
    %334 = arith.select %332, %327, %333 : vector<8x16xi1>, vector<8x16xf32>
    %cst_72 = arith.constant dense<0xFF800000> : vector<8xf32>
    %335 = vector.multi_reduction <maximumf>, %334, %cst_72 [1] : vector<8x16xf32> to vector<8xf32>
    %336 = vector.shape_cast %335 : vector<8xf32> to vector<8x1xf32>
    %337 = vector.broadcast %336 : vector<8x1xf32> to vector<8x16xf32>
    %338 = arith.subf %334, %337 : vector<8x16xf32>
    %339 = math.exp %338 : vector<8x16xf32>
    %cst_73 = arith.constant dense<0.000000e+00> : vector<8xf32>
    %340 = vector.multi_reduction <add>, %339, %cst_73 [1] : vector<8x16xf32> to vector<8xf32>
    %341 = vector.shape_cast %340 : vector<8xf32> to vector<8x1xf32>
    %342 = tpu.reciprocal %341 {approx = true} : vector<8x1xf32> -> vector<8x1xf32>
    %343 = vector.broadcast %342 : vector<8x1xf32> to vector<8x16xf32>
    %344 = arith.mulf %339, %343 : vector<8x16xf32>
    %c0_74 = arith.constant 0 : index
    %c0_75 = arith.constant 0 : index
    %c0_76 = arith.constant 0 : index
    %345 = vector.load %arg5[%c0_74, %c0_75, %c0_76] : memref<1x16x128xf32, #tpu.memory_space<vmem>>, vector<1x16x128xf32>
    %346 = vector.shape_cast %345 : vector<1x16x128xf32> to vector<16x128xf32>
    %cst_77 = arith.constant dense<0.000000e+00> : vector<8x128xf32>
    %347 = tpu.matmul %344, %346, %cst_77 {dimension_numbers = #tpu.dot_dimension_numbers<[1], [0], [0], [1], [0, 0, 1, 1], [], []>} : vector<8x16xf32>, vector<16x128xf32>, vector<8x128xf32> -> vector<8x128xf32>
    %c0_78 = arith.constant 0 : index
    %c0_79 = arith.constant 0 : index
    %c0_80 = arith.constant 0 : index
    %348 = vector.load %arg9[%c0_78, %c0_79, %c0_80] : memref<1x8x128xf32, #tpu.memory_space<vmem>>, vector<1x8x128xf32>
    %349 = vector.shape_cast %348 : vector<1x8x128xf32> to vector<8x128xf32>
    %350 = vector.shape_cast %347 : vector<8x128xf32> to vector<1x8x128xf32>
    tpu.vector_store %arg9[%c0_78, %c0_79, %c0_80], %350 {strides = array<i32>} : memref<1x8x128xf32, #tpu.memory_space<vmem>>, vector<1x8x128xf32>,
    return
  }
  func.func @transform_0(%arg0: i32, %arg1: i32, %arg2: memref<2xi32, #tpu.memory_space<smem>>) -> (i32, i32, i32) {
    %c0_i32 = arith.constant 0 : i32
    %c0_i32_0 = arith.constant 0 : i32
    return %arg0, %arg1, %c0_i32 : i32, i32, i32
  }
  func.func @transform_1(%arg0: i32, %arg1: i32, %arg2: memref<2xi32, #tpu.memory_space<smem>>) -> (i32, i32, i32) {
    %c0_i32 = arith.constant 0 : i32
    %c0_i32_0 = arith.constant 0 : i32
    %c0_i32_1 = arith.constant 0 : i32
    return %arg0, %c0_i32, %c0_i32_0 : i32, i32, i32
  }
  func.func @transform_2(%arg0: i32, %arg1: i32, %arg2: memref<2xi32, #tpu.memory_space<smem>>) -> (i32, i32, i32) {
    %c0_i32 = arith.constant 0 : i32
    %c0_i32_0 = arith.constant 0 : i32
    %c0_i32_1 = arith.constant 0 : i32
    return %arg0, %c0_i32, %c0_i32_0 : i32, i32, i32
  }
  func.func @transform_3(%arg0: i32, %arg1: i32, %arg2: memref<2xi32, #tpu.memory_space<smem>>) -> (i32, i32) {
    %c0_i32 = arith.constant 0 : i32
    %c0_i32_0 = arith.constant 0 : i32
    %c0_i32_1 = arith.constant 0 : i32
    return %c0_i32, %c0_i32_0 : i32, i32
  }
  func.func @transform_4(%arg0: i32, %arg1: i32, %arg2: memref<2xi32, #tpu.memory_space<smem>>) -> (i32, i32) {
    %c0_i32 = arith.constant 0 : i32
    %c0_i32_0 = arith.constant 0 : i32
    %c0_i32_1 = arith.constant 0 : i32
    return %c0_i32, %c0_i32_0 : i32, i32
  }
  func.func @transform_5(%arg0: i32, %arg1: i32, %arg2: memref<2xi32, #tpu.memory_space<smem>>) -> i32 {
    %c0_i32 = arith.constant 0 : i32
    %c0_i32_0 = arith.constant 0 : i32
    return %c0_i32 : i32
  }
  func.func @transform_6(%arg0: i32, %arg1: i32, %arg2: memref<2xi32, #tpu.memory_space<smem>>) -> (i32, i32, i32) {
    %c0_i32 = arith.constant 0 : i32
    %c0_i32_0 = arith.constant 0 : i32
    return %arg0, %arg1, %c0_i32 : i32, i32, i32
  }
}

</mosaic_0001>

<bundles_post_ra>
// kernel: mlp_attention.1
= control target key start
LH: loop header
LB: loop body
LE: loop exit
PB: predicated region body
PF: predicated region fallthrough
CT: control target
= control target key end

     0   :  { %s2018_s0 = inlined_call_operand.vmem [shape: s32[2], index: 0, kind: input, shape index: {}]   ;;  %s2019_s1 = inlined_call_operand.vmem [shape: f32[2,8,32], index: 1, kind: input, shape index: {}]   ;;  %s2020_s2 = inlined_call_operand.vmem [shape: f32[2,16,32], index: 2, kind: input, shape index: {}]   ;;  %s2021_s3 = inlined_call_operand.vmem [shape: f32[2,16,128], index: 3, kind: input, shape index: {}]   ;;  %s2022_s4 = inlined_call_operand.vmem [shape: f32[32,32], index: 4, kind: input, shape index: {}]   ;;  %s2023_s5 = inlined_call_operand.vmem [shape: f32[32,32], index: 5, kind: input, shape index: {}]   ;;  %s2024_s6 = inlined_call_operand.vmem [shape: f32[32], index: 6, kind: input, shape index: {}]   ;;  %s2025_s7 = inlined_call_operand.hbm [shape: f32[2,8,128], index: 7, kind: output, shape index: {}]  }
   0x1   :  { %s12_s26 = sshll.u32 %s2018_s0, 4  ;;  %s13_s26 = int_to_ptr.vmem [resolvable:$true] %s12_s26 }
   0x2   :  { %s1578_s27 = scalar_lea.vmem %s13_s26, 16  ;;  %p1583_p1 = scmp.lt.s32.totalorder %s13_s26, %s13_s26 }
   0x3   :  { %p1579_p0 = scmp.ne.s32.totalorder %s13_s26, %s1578_s27  ;;  %p1584_p2 = scmp.lt.s32.totalorder %s1578_s27, %s1578_s27 }
   0x5   :  { %p1585_p3 = por %p1584_p2, %p1583_p1 }
   0x7   :  { %p1586_p4 = pnand %p1585_p3, %p1579_p0 }
   0x9   :  { %1589 = shalt.err (!%p1586_p4)  }
   0xa   :  { %s1691_s28 = smov [#allocation4]  }
   0xb   :  { %15 = dma.vmem_to_smem %s13_s26, 16, %s1691_s28, [#allocation3] }
   0xc   :  { %1657 = dma.done.wait [#allocation3], 16 }
   0xd   :  { %1658 = vsyncadd [#allocation3], 4294967280 }
   0xe   :  { %17 = sfence }
   0xf   :  { %18 = vsyncpa [#allocation7], 0 }
  0x10   :  { %19 = vsyncpa [#allocation6], 0 }
  0x11   :  { %21 = vsyncpa [#allocation6 + $0x1], 0  ;;  %s1772_s29 = smov 0   ;;  %s1774_s30 = smov 0  }
  0x12   :  { %s1776_s0 = smov 0   ;;  %s1778_s8 = smov 0  }
  0x13   :  { %s1780_s9 = smov 0   ;;  %s1782_s10 = smov 0  }
  0x14 LB: > { %s1228_s11 = sadd.s32 4294967295, %s1689_s10   ;;  %s1229_s12 = sadd.s32 4294967294, %s1689_s10   ;;  %s1689_s10 = sphi %s1782_s10, %s27_s10   ;;  %s1685_s9 = sphi %s1780_s9, %s2034_s9   ;;  %s1681_s8 = sphi %s1778_s8, %s2033_s8   ;;  %s1677_s0 = sphi %s1776_s0, %s2032_s0   ;;  %s1673_s30 = sphi %s1774_s30, %s2031_s30   ;;  %s1669_s29 = sphi %s1772_s29, %s2030_s29  }
  0x15   : > { %s39_s13 = sadd.s32 1, %s1685_s9  ;;  %s191_s14 = sadd.s32 1, %s1677_s0 }
  0x16   : > { %p41_p5 = scmp.ge.s32.totalorder %s39_s13, 2  ;;  %p201_p6 = scmp.ne.s32.totalorder %s1677_s0, %s1673_s30 }
  0x17   : > { %p202_p7 = scmp.eq.s32.totalorder %s1228_s11, 1  ;;  %p207_p8 = scmp.ne.s32.totalorder %s1673_s30, %s1669_s29 }
  0x18   : > { %s2036_s13 = smov (%p41_p5, %s39_s13), 0  ;;  %p208_p10 = scmp.eq.s32.totalorder %s1229_s12, 1 }
  0x19   : > { %p1812_p9 = por %p202_p7, %p201_p6  ;;  %s186_s16 = ssub.s32 %s1685_s9, %s2036_s13 }
  0x1a   : > { %p1230_p11 = scmp.ge.s32.totalorder %s1689_s10, 1  ;;  %p189_p12 = scmp.eq.s32.totalorder %s186_s16, 0 }
  0x1b   : > { %p1819_p13 = por %p208_p10, %p207_p8  ;;  %p215_p0 = scmp.lt.s32.totalorder %s1689_s10, 3 }
  0x1c   : > { %s1825_s18 = scalar_select %p189_p12, %s1677_s0, %s191_s14  }
  0x1d   : > { %p1827_p1 = pnand %p1230_p11, %p215_p0  ;;  %p1831_p2 = scmp.eq.s32.totalorder %s1228_s11, 0 }
  0x1e   : > { %s234_s23 = sshll.u32 %s2024_s6, 4  ;;  %s235_s23 = int_to_ptr.vmem [resolvable:$true] %s234_s23 }
  0x1f   : > { %p1381_p3 = pneg %p1827_p1  ;;  %s1590_s24 = scalar_lea.vmem %s235_s23, 16 }
  0x20   : > { %p1591_p5 = scmp.ne.s32.totalorder %s235_s23, %s1590_s24  ;;  %p1598_p10 = scmp.lt.s32.totalorder %s235_s23, %s235_s23 }
  0x21   : > { %p1382_p4 = pnand %p1831_p2, %p1381_p3  ;;  %p1599_p11 = scmp.lt.s32.totalorder %s1590_s24, %s1590_s24 }
  0x23   : > { %p1592_p6 = pneg %p1382_p4  ;;  %p1600_p12 = por %p1599_p11, %p1598_p10 }
  0x25   : > { %p1593_p7 = pnand %p1592_p6, %p1591_p5 }
  0x27   : > { %p1594_p8 = pneg %p1593_p7 }
  0x29   : > { %p1601_p0 = pnand %p1600_p12, %p1594_p8 }
  0x2b   : > { %1604 = shalt.err (!%p1601_p0)
}
  0x2c   : > { %s1692_s25 = smov [#allocation5]   ;;  %273 = sbr.rel (%p1827_p1) target bundleno = 1062 (0x426), region = 44 }
  0x2d   : > { %1384 = dma.vmem_to_smem (!%p1382_p4), %s235_s23, 16, %s1692_s25, [#allocation7]  }
  0x33   : > { %1660 = dma.done.wait (%p1831_p2), [#allocation7], 16  }
  0x34   : > { %1662 = vsyncadd (%p1831_p2), [#allocation7], 4294967280 }
  0x35   : > { %279 = sfence }
  0x36   : > { %v453_v0 = vld [vmem:[%s2022_s4] sm:$0xff]  ;;  %v454_v1 = vld [vmem:[%s2022_s4 + $0x8] sm:$0xff]  ;;  %v455_v2 = vld [vmem:[%s2022_s4 + $0x10] sm:$0xff]  ;;  %v1693_v3 = vmov 0.0|0.0   ;;  %vm1694_vm0 = vmmov 0   ;;  %v1695_v6 = vmov 0.0  }
  0x37   : > { %1366 = vmatprep.subr.bf16.mxu1 %v1693_v3  ;;  %v1367_v4 = vpack.c.bf16 %v454_v1, %v453_v0  ;;  %v456_v5 = vld [vmem:[%s2022_s4 + $0x18] sm:$0xff]  ;;  %1350 = vmatprep.mubr.msk.f32.mxu1 %vm1694_vm0, %v1695_v6  ;;  %p316_p1 = scmp.lt.s32.totalorder %s1681_s8, 1  ;;  %vm343_vm1 = vcmask 261120   ;;  %v337_v7 = vld [vmem:[%s2023_s5] sm:$0xff]  ;;  %v1696_v8 = vmov 2   ;;  %v1697_v10 = vmov 0  }
  0x38   : > { %1336 = vmatprep.mubr.msk.f32.mxu0 %vm343_vm1, %v337_v7  ;;  %1479 = vset.pattern.permute.xlu1 %v1696_v8  ;;  %v1370_v9 = vpack.c.bf16 %v456_v5, %v455_v2  ;;  %vm1361_vm2 = vmpackc.low %vm343_vm1, %vm343_vm1  ;;  %v338_v15 = vld [vmem:[%s2023_s5 + $0x8] sm:$0xff]  ;;  %v339_v16 = vld [vmem:[%s2023_s5 + $0x10] sm:$0xff]  ;;  %v1698_v20 = vmov 3   ;;  %v1699_v21 = vmov 1   ;;  %vm447_vm3 = vcmask 130048   ;;  %s532_s25 = sld [smem:[#allocation5]] }
  0x39   : > { %1368 = vmatpush3.bf16.msra.mxu1 %v1367_v4  ;;  %s1867_s22 = scalar_select %p316_p1, %s1681_s8, 1  ;;  %1477 = vset.pattern.permute.xlu0 %v1697_v10  ;;  %v340_v17 = vld [vmem:[%s2023_s5 + $0x18] sm:$0xff]  ;;  %v1700_v24 = vmov 4   ;;  %v1701_v25 = vmov 5   ;;  %v1702_v26 = vmov 6   ;;  %v1703_v27 = vmov 8  }
  0x3a   : > { %1369 = vmatprep.subr.bf16.mxu1 %v1693_v3  ;;  %v1704_v28 = vmov 7   ;;  %v1705_v29 = vmov 11   ;;  %v1706_v32 = vmov 9   ;;  %v1707_v33 = vmov 14   ;;  %s1249_s26 = sld [smem:[#allocation5 + $0x1]]  ;;  %s1935_s28 = sld [smem:[#allocation5 + $0x3]] }
  0x3b   : > { %s1236_s23 = sshll.u32 %s1867_s22, 3  ;;  %s1316_s24 = sshll.u32 %s1867_s22, 4  ;;  %v1708_v34 = vmov 10   ;;  %v1709_v35 = vmov 17   ;;  %v1710_v36 = vmov 12   ;;  %v1711_v37 = vmov 20  }
  0x3c   : > { %s322_s27 = scalar_lea.vmem %s2019_s1, %s1236_s23  ;;  %s327_s12 = scalar_lea.vmem %s2020_s2, %s1316_s24  ;;  %v1712_v38 = vmov 13   ;;  %v1713_v39 = vmov 23   ;;  %v1714_v40 = vmov 15   ;;  %v1715_v41 = vmov 26  }
  0x3d   : > { %1371 = vmatpush3.bf16.msra.mxu1 %v1370_v9  ;;  %v452_v11 = vld [vmem:[%s322_s27] sm:$0xff]  ;;  %v342_v13 = vld [vmem:[%s327_s12 + $0x8] sm:$0xff]  ;;  %v1716_v42 = vmov 16   ;;  %v1717_v43 = vmov 29   ;;  %v1718_v44 = vmov 18   ;;  %v1719_v45 = vmov 31  }
  0x3e   : > { %v341_v12 = vld [vmem:[%s327_s12] sm:$0xff]  ;;  %1372 = vmatprep.subr.bf16.mxu1 %v1693_v3  ;;  %v1720_v46 = vmov 19   ;;  %v1721_v47 = vmov 21   ;;  %v1722_v48 = vmov 22   ;;  %v1723_v49 = vmov 24   ;;  %s1933_s27 = sld [smem:[#allocation5 + $0x2]] }
  0x3f   : > { %v1360_v14 = vpack.c.bf16 %v342_v13, %v341_v12  ;;  %v1724_v50 = vmov 25   ;;  %v1725_v51 = vmov 27   ;;  %v1726_v52 = vmov 28   ;;  %s1937_s11 = sld [smem:[#allocation5 + $0x4]]  ;;  %s1939_s12 = sld [smem:[#allocation5 + $0x5]] }
  0x40   : > { %1351 = vmatmul.mubr.msk.f32.vlgmr.msra.gmra.mrb[0].mxu1 %vm343_vm1, %v452_v11  ;;  %v1727_v53 = vmov 30   ;;  %v544_v12 = vstv %s532_s25  ;;  %v559_v13 = vstv %s1249_s26  ;;  %s1942_s14 = sld [smem:[#allocation5 + $0x6]]  ;;  %s1946_s16 = sld [smem:[#allocation5 + $0x7]] }
  0x41   : > { %1362 = vmatprep.subr.msk.bf16.mxu0 %vm1361_vm2, %v1360_v14  ;;  %1357 = vmatprep.mubr.msk.f32.mxu1 %vm1694_vm0, %v1695_v6  ;;  %s1263_s19 = sld [smem:[#allocation5 + $0x8]]  ;;  %s1265_s20 = sld [smem:[#allocation5 + $0x9]] }
  0x42   : > { %1365 = vmatpush3.bf16.xpose.msk.msra.mxu0 %vm1361_vm2, %v1360_v14  ;;  %s1267_s21 = sld [smem:[#allocation5 + $0xa]]  ;;  %s1269_s23 = sld [smem:[#allocation5 + $0xb]] }
  0x43   : > { %s1271_s25 = sld [smem:[#allocation5 + $0xc]]  ;;  %s1951_s26 = sld [smem:[#allocation5 + $0xd]] }
  0x44   : > { %s1313_s22 = sshll.u32 %s1681_s8, 7 }
  0x49   : > { %1337 = vmatmul.mubr.msk.f32.vlgmr.msra.gmra.mrb[0].mxu0 %vm343_vm1, %v338_v15 }
  0x4a   : > { %1339 = vmatprep.mubr.msk.f32.mxu0 %vm343_vm1, %v339_v16 }
  0x4d   : > { %1340 = vmatmul.mubr.msk.f32.gmra.mrb[2].mxu0 %vm343_vm1, %v340_v17 }
 0x113   : > { %v1895_v18 = vpop.f32.mrb[0].mxu1 }
 0x114   : > { %565 = vperm.xlu1 %1479, %v1895_v18   ;;  %535 = vperm.xlu0 %1477, %v1895_v18   ;;  %v1352_v19 = vpop.f32.mrb[1].mxu1 }
 0x115   : > { %v574_v19 = vstv %s1933_s27  ;;  %s1275_s27 = sld [smem:[#allocation5 + $0xe]] }
 0x118   : > { %1480 = vset.pattern.permute.xlu1 %v1698_v20  ;;  %1478 = vset.pattern.permute.xlu0 %v1699_v21 }
 0x119   : > { %580 = vperm.xlu1 %1480, %v1895_v18   ;;  %550 = vperm.xlu0 %1478, %v1895_v18  }
 0x11c   : > { %v1338_v22 = vpop.f32.mrb[0].mxu0 }
 0x11d   : > { %449 = vst.msk [vmem:[#allocation2 + $0x8] sm:$0xff] %vm447_vm3, %v1338_v22  ;;  %v428_v23 = vpop.f32.mrb[1].mxu0  ;;  %1481 = vset.pattern.permute.xlu1 %v1700_v24  ;;  %1482 = vset.pattern.permute.xlu0 %v1701_v25  ;;  %v589_v24 = vstv %s1935_s28  ;;  %v604_v25 = vstv %s1937_s11  ;;  %s1277_s28 = sld [smem:[#allocation5 + $0xf]]  ;;  %s1954_s11 = sld [smem:[#allocation5 + $0x10]] }
 0x11e   : > { %448 = vst.msk [vmem:[#allocation2] sm:$0xff] %vm447_vm3, %v428_v23  ;;  %595 = vperm.xlu1 %1481, %v1895_v18   ;;  %610 = vperm.xlu0 %1482, %v1895_v18  }
 0x120   : > { %v1341_v30 = vpop.f32.mrb[2].mxu0 }
 0x121   : > { %451 = vst.msk [vmem:[#allocation2 + $0x18] sm:$0xff] %vm447_vm3, %v1341_v30  ;;  %v438_v31 = vpop.f32.mrb[3].mxu0 }
 0x122   : > { %1483 = vset.pattern.permute.xlu1 %v1702_v26  ;;  %1485 = vset.pattern.permute.xlu0 %v1703_v27  ;;  %450 = vst.msk [vmem:[#allocation2 + $0x10] sm:$0xff] %vm447_vm3, %v438_v31 }
 0x123   : > { %625 = vperm.xlu1 %1483, %v1895_v18   ;;  %655 = vperm.xlu0 %1485, %v1895_v18  }
 0x124   : > { %v1264_v15 = vld [vmem:[#allocation2 + $0x8] ss:$0 sm:$0xff]  ;;  %v1266_v31 = vld [vmem:[#allocation2 + $0x9] ss:$0 sm:$0xff] }
 0x125   : > { %v1248_v55 = vld [vmem:[#allocation2] ss:$0 sm:$0xff]  ;;  %v1252_v57 = vld [vmem:[#allocation2 + $0x2] ss:$0 sm:$0xff]  ;;  %v1250_v59 = vld [vmem:[#allocation2 + $0x1] ss:$0 sm:$0xff] }
 0x126   : > { %v1254_v61 = vld [vmem:[#allocation2 + $0x3] ss:$0 sm:$0xff]  ;;  %v1256_v2 = vld [vmem:[#allocation2 + $0x4] ss:$0 sm:$0xff]  ;;  %v1258_v3 = vld [vmem:[#allocation2 + $0x5] ss:$0 sm:$0xff] }
 0x127   : > { %1484 = vset.pattern.permute.xlu1 %v1704_v28  ;;  %1488 = vset.pattern.permute.xlu0 %v1705_v29  ;;  %v1260_v8 = vld [vmem:[#allocation2 + $0x6] ss:$0 sm:$0xff]  ;;  %v1262_v17 = vld [vmem:[#allocation2 + $0x7] ss:$0 sm:$0xff] }
 0x128   : > { %640 = vperm.xlu1 %1484, %v1895_v18   ;;  %700 = vperm.xlu0 %1488, %v1895_v18  }
 0x12c   : > { %1486 = vset.pattern.permute.xlu1 %v1706_v32  ;;  %1491 = vset.pattern.permute.xlu0 %v1707_v33 }
 0x12d   : > { %670 = vperm.xlu1 %1486, %v1895_v18   ;;  %745 = vperm.xlu0 %1491, %v1895_v18  }
 0x131   : > { %1487 = vset.pattern.permute.xlu1 %v1708_v34  ;;  %1494 = vset.pattern.permute.xlu0 %v1709_v35 }
 0x132   : > { %685 = vperm.xlu1 %1487, %v1895_v18   ;;  %790 = vperm.xlu0 %1494, %v1895_v18  }
 0x136   : > { %1489 = vset.pattern.permute.xlu1 %v1710_v36  ;;  %1497 = vset.pattern.permute.xlu0 %v1711_v37  ;;  %v619_v36 = vstv %s1939_s12  ;;  %s1281_s12 = sld [smem:[#allocation5 + $0x11]] }
 0x137   : > { %715 = vperm.xlu1 %1489, %v1895_v18   ;;  %835 = vperm.xlu0 %1497, %v1895_v18  }
 0x13b   : > { %1490 = vset.pattern.permute.xlu1 %v1712_v38  ;;  %1500 = vset.pattern.permute.xlu0 %v1713_v39 }
 0x13c   : > { %730 = vperm.xlu1 %1490, %v1895_v18   ;;  %880 = vperm.xlu0 %1500, %v1895_v18  }
 0x140   : > { %1492 = vset.pattern.permute.xlu1 %v1714_v40  ;;  %1503 = vset.pattern.permute.xlu0 %v1715_v41  ;;  %v634_v40 = vstv %s1942_s14  ;;  %s1283_s14 = sld [smem:[#allocation5 + $0x12]] }
 0x141   : > { %760 = vperm.xlu1 %1492, %v1895_v18   ;;  %925 = vperm.xlu0 %1503, %v1895_v18  }
 0x145   : > { %1493 = vset.pattern.permute.xlu1 %v1716_v42  ;;  %1506 = vset.pattern.permute.xlu0 %v1717_v43 }
 0x146   : > { %775 = vperm.xlu1 %1493, %v1895_v18   ;;  %970 = vperm.xlu0 %1506, %v1895_v18  }
 0x14a   : > { %1495 = vset.pattern.permute.xlu1 %v1718_v44  ;;  %1509 = vset.pattern.permute.xlu0 %v1719_v45  ;;  %v1270_v44 = vld [vmem:[#allocation2 + $0xb] ss:$0 sm:$0xff] }
 0x14b   : > { %805 = vperm.xlu1 %1495, %v1895_v18  }
 0x14f   : > { %1496 = vset.pattern.permute.xlu1 %v1720_v46  ;;  %v1268_v46 = vld [vmem:[#allocation2 + $0xa] ss:$0 sm:$0xff] }
 0x150   : > { %820 = vperm.xlu1 %1496, %v1895_v18  }
 0x154   : > { %1498 = vset.pattern.permute.xlu1 %v1721_v47 }
 0x155   : > { %850 = vperm.xlu1 %1498, %v1895_v18  }
 0x159   : > { %1499 = vset.pattern.permute.xlu1 %v1722_v48 }
 0x15a   : > { %865 = vperm.xlu1 %1499, %v1895_v18  }
 0x15e   : > { %1501 = vset.pattern.permute.xlu1 %v1723_v49 }
 0x15f   : > { %895 = vperm.xlu1 %1501, %v1895_v18  }
 0x163   : > { %1502 = vset.pattern.permute.xlu1 %v1724_v50  ;;  %v649_v50 = vstv %s1946_s16  ;;  %s1285_s16 = sld [smem:[#allocation5 + $0x13]] }
 0x164   : > { %910 = vperm.xlu1 %1502, %v1895_v18  }
 0x168   : > { %1504 = vset.pattern.permute.xlu1 %v1725_v51 }
 0x169   : > { %940 = vperm.xlu1 %1504, %v1895_v18  }
 0x16d   : > { %1505 = vset.pattern.permute.xlu1 %v1726_v52 }
 0x16e   : > { %955 = vperm.xlu1 %1505, %v1895_v18  }
 0x172   : > { %1507 = vset.pattern.permute.xlu1 %v1727_v53 }
 0x173   : > { %985 = vperm.xlu1 %1507, %v1895_v18  }
 0x177   : > { %1508 = vset.pattern.permute.xlu1 %v1719_v45 }
 0x178   : > { %1000 = vperm.xlu1 %1508, %v1895_v18  }
 0x193   : > { %v566_v54 = vpop.permute.xlu1 %565  ;;  %v536_v56 = vpop.permute.xlu0 %535 }
 0x194   : > { %v542_v58 = vadd.f32 %v1248_v55, %v536_v56  ;;  %v572_v60 = vadd.f32 %v1252_v57, %v566_v54  ;;  %v1272_v54 = vld [vmem:[#allocation2 + $0xc] ss:$0 sm:$0xff] }
 0x196   : > { %1510 = vtanh.f32 %v542_v58  ;;  %v664_v58 = vstv %s1263_s19  ;;  %s1287_s19 = sld [smem:[#allocation5 + $0x14]] }
 0x197   : > { %1512 = vtanh.f32 %v572_v60 }
 0x198   : > { %v581_v62 = vpop.permute.xlu1 %580  ;;  %v551_v63 = vpop.permute.xlu0 %550 }
 0x199   : > { %v557_v0 = vadd.f32 %v1250_v59, %v551_v63  ;;  %v587_v1 = vadd.f32 %v1254_v61, %v581_v62  ;;  %v679_v62 = vstv %s1265_s20  ;;  %s1289_s20 = sld [smem:[#allocation5 + $0x15]] }
 0x19b   : > { %1514 = vtanh.f32 %v557_v0 }
 0x19c   : > { %1516 = vtanh.f32 %v587_v1  ;;  %v1276_v1 = vld [vmem:[#allocation2 + $0xe] ss:$0 sm:$0xff] }
 0x19d   : > { %v596_v4 = vpop.permute.xlu1 %595  ;;  %v611_v5 = vpop.permute.xlu0 %610 }
 0x19e   : > { %v602_v6 = vadd.f32 %v1256_v2, %v596_v4  ;;  %v617_v7 = vadd.f32 %v1258_v3, %v611_v5  ;;  %v1274_v3 = vld [vmem:[#allocation2 + $0xd] ss:$0 sm:$0xff] }
 0x1a0   : > { %1518 = vtanh.f32 %v602_v6  ;;  %v1511_v11 = vpop.eup %1510 }
 0x1a1   : > { %1520 = vtanh.f32 %v617_v7  ;;  %v1513_v14 = vpop.eup %1512  ;;  %v545_v20 = vmul.f32 %v1511_v11, %v544_v12 }
 0x1a2   : > { %v626_v9 = vpop.permute.xlu1 %625  ;;  %v656_v16 = vpop.permute.xlu0 %655  ;;  %v575_v28 = vmul.f32 %v1513_v14, %v574_v19  ;;  %v709_v14 = vstv %s1269_s23  ;;  %v724_v19 = vstv %s1271_s25  ;;  %s1293_s23 = sld [smem:[#allocation5 + $0x17]]  ;;  %s1295_s25 = sld [smem:[#allocation5 + $0x18]] }
 0x1a3   : > { %v632_v10 = vadd.f32 %v1260_v8, %v626_v9  ;;  %v662_v26 = vadd.f32 %v1264_v15, %v656_v16  ;;  %v694_v8 = vstv %s1267_s21  ;;  %v1278_v15 = vld [vmem:[#allocation2 + $0xf] ss:$0 sm:$0xff]  ;;  %s1291_s21 = sld [smem:[#allocation5 + $0x16]] }
 0x1a5   : > { %1522 = vtanh.f32 %v632_v10  ;;  %v1515_v18 = vpop.eup %1514 }
 0x1a6   : > { %v560_v21 = vmul.f32 %v1515_v18, %v559_v13  ;;  %v1517_v23 = vpop.eup %1516 }
 0x1a7   : > { %v641_v22 = vpop.permute.xlu1 %640  ;;  %v590_v32 = vmul.f32 %v1517_v23, %v589_v24  ;;  %v701_v45 = vpop.permute.xlu0 %700  ;;  %v1280_v24 = vld [vmem:[#allocation2 + $0x10] ss:$0 sm:$0xff] }
 0x1a8   : > { %v647_v27 = vadd.f32 %v1262_v17, %v641_v22  ;;  %v561_v29 = vadd.f32 %v560_v21, %v545_v20  ;;  %v707_v51 = vadd.f32 %v1270_v44, %v701_v45  ;;  %v1282_v22 = vld [vmem:[#allocation2 + $0x11] ss:$0 sm:$0xff]  ;;  %v1286_v45 = vld [vmem:[#allocation2 + $0x13] ss:$0 sm:$0xff] }
 0x1aa   : > { %v1519_v30 = vpop.eup %1518  ;;  %1524 = vtanh.f32 %v647_v27  ;;  %v576_v33 = vadd.f32 %v575_v28, %v561_v29  ;;  %v739_v29 = vstv %s1951_s26  ;;  %s1297_s26 = sld [smem:[#allocation5 + $0x19]] }
 0x1ab   : > { %v605_v34 = vmul.f32 %v1519_v30, %v604_v25  ;;  %v1521_v35 = vpop.eup %1520  ;;  %1526 = vtanh.f32 %v662_v26 }
 0x1ac   : > { %v671_v37 = vpop.permute.xlu1 %670  ;;  %v591_v38 = vadd.f32 %v590_v32, %v576_v33  ;;  %v620_v43 = vmul.f32 %v1521_v35, %v619_v36  ;;  %v746_v2 = vpop.permute.xlu0 %745  ;;  %v1284_v32 = vld [vmem:[#allocation2 + $0x12] ss:$0 sm:$0xff]  ;;  %v754_v36 = vstv %s1275_s27  ;;  %s1299_s27 = sld [smem:[#allocation5 + $0x1a]] }
 0x1ad   : > { %v677_v39 = vadd.f32 %v1266_v31, %v671_v37  ;;  %v752_v7 = vadd.f32 %v1276_v1, %v746_v2  ;;  %v1292_v2 = vld [vmem:[#allocation2 + $0x16] ss:$0 sm:$0xff] }
 0x1ae   : > { %v606_v42 = vadd.f32 %v605_v34, %v591_v38 }
 0x1af   : > { %v1523_v41 = vpop.eup %1522  ;;  %1528 = vtanh.f32 %v677_v39 }
 0x1b0   : > { %v621_v47 = vadd.f32 %v620_v43, %v606_v42  ;;  %v635_v48 = vmul.f32 %v1523_v41, %v634_v40  ;;  %v769_v40 = vstv %s1277_s28  ;;  %v1288_v43 = vld [vmem:[#allocation2 + $0x14] ss:$0 sm:$0xff]  ;;  %s1301_s28 = sld [smem:[#allocation5 + $0x1b]] }
 0x1b1   : > { %v686_v49 = vpop.permute.xlu1 %685  ;;  %v791_v23 = vpop.permute.xlu0 %790 }
 0x1b2   : > { %v692_v52 = vadd.f32 %v1268_v46, %v686_v49  ;;  %v636_v55 = vadd.f32 %v635_v48, %v621_v47  ;;  %v797_v28 = vadd.f32 %v1282_v22, %v791_v23 }
 0x1b4   : > { %v1525_v53 = vpop.eup %1524  ;;  %1530 = vtanh.f32 %v692_v52 }
 0x1b5   : > { %v650_v56 = vmul.f32 %v1525_v53, %v649_v50  ;;  %v1527_v57 = vpop.eup %1526  ;;  %1532 = vtanh.f32 %v707_v51  ;;  %v784_v50 = vstv %s1954_s11  ;;  %v1290_v53 = vld [vmem:[#allocation2 + $0x15] ss:$0 sm:$0xff]  ;;  %s1303_s11 = sld [smem:[#allocation5 + $0x1c]] }
 0x1b6   : > { %v716_v59 = vpop.permute.xlu1 %715  ;;  %v665_v0 = vmul.f32 %v1527_v57, %v664_v58  ;;  %v836_v44 = vpop.permute.xlu0 %835  ;;  %v799_v57 = vstv %s1281_s12  ;;  %s1305_s12 = sld [smem:[#allocation5 + $0x1d]] }
 0x1b7   : > { %v651_v60 = vadd.f32 %v650_v56, %v636_v55  ;;  %v722_v61 = vadd.f32 %v1272_v54, %v716_v59  ;;  %v842_v49 = vadd.f32 %v1288_v43, %v836_v44 }
 0x1b9   : > { %v1529_v63 = vpop.eup %1528  ;;  %1534 = vtanh.f32 %v722_v61  ;;  %v666_v4 = vadd.f32 %v665_v0, %v651_v60  ;;  %v814_v61 = vstv %s1283_s14  ;;  %v1294_v0 = vld [vmem:[#allocation2 + $0x17] ss:$0 sm:$0xff]  ;;  %s1307_s14 = sld [smem:[#allocation5 + $0x1e]] }
 0x1ba   : > { %v680_v5 = vmul.f32 %v1529_v63, %v679_v62 }
 0x1bb   : > { %v731_v6 = vpop.permute.xlu1 %730  ;;  %v881_v1 = vpop.permute.xlu0 %880 }
 0x1bc   : > { %v737_v9 = vadd.f32 %v1274_v3, %v731_v6  ;;  %v681_v11 = vadd.f32 %v680_v5, %v666_v4  ;;  %v887_v6 = vadd.f32 %v1294_v0, %v881_v1  ;;  %v1310_v0 = vld [vmem:[#allocation2 + $0x1f] ss:$0 sm:$0xff] }
 0x1be   : > { %v1531_v10 = vpop.eup %1530  ;;  %1536 = vtanh.f32 %v737_v9 }
 0x1bf   : > { %v695_v12 = vmul.f32 %v1531_v10, %v694_v8  ;;  %v1533_v13 = vpop.eup %1532  ;;  %1538 = vtanh.f32 %v752_v7  ;;  %v829_v7 = vstv %s1285_s16  ;;  %s1309_s16 = sld [smem:[#allocation5 + $0x1f]] }
 0x1c0   : > { %v761_v16 = vpop.permute.xlu1 %760  ;;  %v710_v21 = vmul.f32 %v1533_v13, %v709_v14  ;;  %v844_v13 = vstv %s1287_s19  ;;  %v1296_v14 = vld [vmem:[#allocation2 + $0x18] ss:$0 sm:$0xff]  ;;  %v926_v22 = vpop.permute.xlu0 %925  ;;  %s1014_s19 = sld [smem:[#allocation4 + %s1681_s8]]  ;;  %s1728_s8 = smov [#allocation8]  }
 0x1c1   : > { %v696_v17 = vadd.f32 %v695_v12, %v681_v11  ;;  %v767_v18 = vadd.f32 %v1278_v15, %v761_v16 }
 0x1c3   : > { %v1535_v20 = vpop.eup %1534  ;;  %1540 = vtanh.f32 %v767_v18  ;;  %v711_v25 = vadd.f32 %v710_v21, %v696_v17  ;;  %v859_v18 = vstv %s1289_s20  ;;  %v1300_v21 = vld [vmem:[#allocation2 + $0x1a] ss:$0 sm:$0xff] }
 0x1c4   : > { %v725_v26 = vmul.f32 %v1535_v20, %v724_v19 }
 0x1c5   : > { %v776_v27 = vpop.permute.xlu1 %775  ;;  %v971_v43 = vpop.permute.xlu0 %970 }
 0x1c6   : > { %v782_v30 = vadd.f32 %v1280_v24, %v776_v27  ;;  %v726_v33 = vadd.f32 %v725_v26, %v711_v25  ;;  %v1298_v25 = vld [vmem:[#allocation2 + $0x19] ss:$0 sm:$0xff]  ;;  %v932_v27 = vadd.f32 %v1300_v21, %v926_v22 }
 0x1c8   : > { %v1537_v31 = vpop.eup %1536  ;;  %1542 = vtanh.f32 %v782_v30 }
 0x1c9   : > { %v740_v34 = vmul.f32 %v1537_v31, %v739_v29  ;;  %v1539_v35 = vpop.eup %1538  ;;  %1544 = vtanh.f32 %v797_v28  ;;  %v874_v28 = vstv %s1291_s21 }
 0x1ca   : > { %v806_v37 = vpop.permute.xlu1 %805  ;;  %v755_v42 = vmul.f32 %v1539_v35, %v754_v36  ;;  %v1302_v35 = vld [vmem:[#allocation2 + $0x1b] ss:$0 sm:$0xff] }
 0x1cb   : > { %v741_v38 = vadd.f32 %v740_v34, %v726_v33  ;;  %v812_v39 = vadd.f32 %v1284_v32, %v806_v37  ;;  %v889_v34 = vstv %s1293_s23  ;;  %s332_s23 = scalar_lea.vmem %s2021_s3, %s1316_s24 }
 0x1cd   : > { %v1541_v41 = vpop.eup %1540  ;;  %1546 = vtanh.f32 %v812_v39  ;;  %v756_v46 = vadd.f32 %v755_v42, %v741_v38  ;;  %v904_v39 = vstv %s1295_s25  ;;  %v1306_v42 = vld [vmem:[#allocation2 + $0x1d] ss:$0 sm:$0xff]  ;;  %s313_s25 = sand.u32 1, %s1673_s30  }
 0x1ce   : > { %v770_v47 = vmul.f32 %v1541_v41, %v769_v40 }
 0x1cf   : > { %v821_v48 = vpop.permute.xlu1 %820 }
 0x1d0   : > { %v827_v51 = vadd.f32 %v1286_v45, %v821_v48  ;;  %v771_v54 = vadd.f32 %v770_v47, %v756_v46  ;;  %v1304_v46 = vld [vmem:[#allocation2 + $0x1c] ss:$0 sm:$0xff]  ;;  %v977_v48 = vadd.f32 %v1306_v42, %v971_v43 }
 0x1d2   : > { %v1543_v52 = vpop.eup %1542  ;;  %1548 = vtanh.f32 %v827_v51 }
 0x1d3   : > { %v785_v55 = vmul.f32 %v1543_v52, %v784_v50  ;;  %v1545_v56 = vpop.eup %1544  ;;  %1550 = vtanh.f32 %v842_v49  ;;  %v919_v49 = vstv %s1297_s26  ;;  %s1235_s26 = sshll.u32 %s313_s25, 3 }
 0x1d4   : > { %v851_v58 = vpop.permute.xlu1 %850  ;;  %v800_v63 = vmul.f32 %v1545_v56, %v799_v57  ;;  %v1308_v56 = vld [vmem:[#allocation2 + $0x1e] ss:$0 sm:$0xff] }
 0x1d5   : > { %v786_v59 = vadd.f32 %v785_v55, %v771_v54  ;;  %v857_v60 = vadd.f32 %v1290_v53, %v851_v58  ;;  %v934_v55 = vstv %s1299_s27  ;;  %s315_s27 = scalar_lea.vmem [#allocation8], %s1235_s26 }
 0x1d7   : > { %v1547_v62 = vpop.eup %1546  ;;  %1552 = vtanh.f32 %v857_v60  ;;  %v801_v3 = vadd.f32 %v800_v63, %v786_v59  ;;  %v949_v60 = vstv %s1301_s28  ;;  %s1121_s28 = sshll.u32 %s315_s27, 4  ;;  %s1968_s28 = int_to_ptr.vmem [resolvable:$true] %s1121_s28 }
 0x1d8   : > { %v815_v4 = vmul.f32 %v1547_v62, %v814_v61 }
 0x1d9   : > { %v866_v5 = vpop.permute.xlu1 %865 }
 0x1da   : > { %v872_v8 = vadd.f32 %v1292_v2, %v866_v5  ;;  %v816_v10 = vadd.f32 %v815_v4, %v801_v3  ;;  %v964_v4 = vstv %s1303_s11 }
 0x1dc   : > { %v1549_v9 = vpop.eup %1548  ;;  %1554 = vtanh.f32 %v872_v8 }
 0x1dd   : > { %v830_v11 = vmul.f32 %v1549_v9, %v829_v7  ;;  %v1551_v12 = vpop.eup %1550  ;;  %1556 = vtanh.f32 %v887_v6  ;;  %v979_v9 = vstv %s1305_s12  ;;  %s1973_s12 = scalar_lea.hbm %s2025_s7, %s1313_s22 }
 0x1de   : > { %v896_v15 = vpop.permute.xlu1 %895  ;;  %v845_v20 = vmul.f32 %v1551_v12, %v844_v13  ;;  %v1012_v12 = vlaneseq }
 0x1df   : > { %v831_v16 = vadd.f32 %v830_v11, %v816_v10  ;;  %v902_v17 = vadd.f32 %v1296_v14, %v896_v15  ;;  %v994_v11 = vstv %s1307_s14  ;;  %s1107_s14 = scalar_lea.sflag [#allocation6], %s313_s25 }
 0x1e1   : > { %v1553_v19 = vpop.eup %1552  ;;  %1558 = vtanh.f32 %v902_v17  ;;  %v846_v23 = vadd.f32 %v845_v20, %v831_v16  ;;  %v1009_v17 = vstv %s1309_s16  ;;  %s1605_s16 = scalar_lea.vmem %s1968_s28, 128 }
 0x1e2   : > { %v860_v24 = vmul.f32 %v1553_v19, %v859_v18  ;;  %v1013_v18 = vand.u32 127, %v1012_v12  ;;  %v1015_v19 = vstv %s1014_s19  ;;  %p1606_p2 = scmp.ne.s32.totalorder %s1968_s28, %s1605_s16  ;;  %s1609_s19 = sshll.u32 %s1728_s8, 4  ;;  %s1610_s19 = int_to_ptr.vmem [resolvable:$false] %s1609_s19 }
 0x1e3   : > { %v911_v26 = vpop.permute.xlu1 %910  ;;  %s1611_s20 = scalar_lea.vmem %s1610_s19, 256  ;;  %p1612_p5 = scmp.lt.s32.totalorder %s1968_s28, %s1610_s19 }
 0x1e4   : > { %v917_v29 = vadd.f32 %v1298_v25, %v911_v26  ;;  %v861_v31 = vadd.f32 %v860_v24, %v846_v23  ;;  %vm1016_vm4 = vcmp.lt.s32.totalorder %v1013_v18, %v1015_v19  ;;  %p1607_p3 = pnand %p1606_p2, %p1812_p9  ;;  %p1613_p6 = scmp.lt.s32.totalorder %s1611_s20, %s1605_s16 }
 0x1e6   : > { %v1555_v30 = vpop.eup %1554  ;;  %1560 = vtanh.f32 %v917_v29  ;;  %p1608_p4 = pneg %p1607_p3  ;;  %p1614_p7 = por %p1613_p6, %p1612_p5 }
 0x1e7   : > { %v875_v32 = vmul.f32 %v1555_v30, %v874_v28  ;;  %v1557_v33 = vpop.eup %1556  ;;  %1562 = vtanh.f32 %v932_v27 }
 0x1e8   : > { %v941_v36 = vpop.permute.xlu1 %940  ;;  %v890_v41 = vmul.f32 %v1557_v33, %v889_v34  ;;  %p1615_p8 = pnand %p1614_p7, %p1608_p4 }
 0x1e9   : > { %v876_v37 = vadd.f32 %v875_v32, %v861_v31  ;;  %v947_v38 = vadd.f32 %v1302_v35, %v941_v36  ;;  %v1030_v31 = vld [vmem:[%s332_s23] sm:$0xff]  ;;  %v1031_v32 = vld [vmem:[%s332_s23 + $0x8] sm:$0xff] }
 0x1ea   : > { %v1373_v33 = vpack.c.bf16 %v1031_v32, %v1030_v31 }
 0x1eb   : > { %v1559_v40 = vpop.eup %1558  ;;  %1564 = vtanh.f32 %v947_v38  ;;  %v891_v44 = vadd.f32 %v890_v41, %v876_v37 }
 0x1ec   : > { %v905_v45 = vmul.f32 %v1559_v40, %v904_v39  ;;  %1374 = vmatpush3.bf16.msra.mxu1 %v1373_v33 }
 0x1ed   : > { %v956_v47 = vpop.permute.xlu1 %955 }
 0x1ee   : > { %v962_v50 = vadd.f32 %v1304_v46, %v956_v47  ;;  %v906_v52 = vadd.f32 %v905_v45, %v891_v44 }
 0x1f0   : > { %v1561_v51 = vpop.eup %1560  ;;  %1566 = vtanh.f32 %v962_v50 }
 0x1f1   : > { %v920_v53 = vmul.f32 %v1561_v51, %v919_v49  ;;  %v1563_v54 = vpop.eup %1562  ;;  %1568 = vtanh.f32 %v977_v48 }
 0x1f2   : > { %v986_v57 = vpop.permute.xlu1 %985  ;;  %v935_v62 = vmul.f32 %v1563_v54, %v934_v55 }
 0x1f3   : > { %v921_v58 = vadd.f32 %v920_v53, %v906_v52  ;;  %v992_v59 = vadd.f32 %v1308_v56, %v986_v57 }
 0x1f5   : > { %v1565_v61 = vpop.eup %1564  ;;  %1570 = vtanh.f32 %v992_v59  ;;  %v936_v2 = vadd.f32 %v935_v62, %v921_v58 }
 0x1f6   : > { %v950_v63 = vmul.f32 %v1565_v61, %v949_v60 }
 0x1f7   : > { %v1001_v1 = vpop.permute.xlu1 %1000 }
 0x1f8   : > { %v1007_v3 = vadd.f32 %v1310_v0, %v1001_v1  ;;  %v951_v6 = vadd.f32 %v950_v63, %v936_v2 }
 0x1fa   : > { %v1567_v5 = vpop.eup %1566  ;;  %1572 = vtanh.f32 %v1007_v3 }
 0x1fb   : > { %v965_v7 = vmul.f32 %v1567_v5, %v964_v4  ;;  %v1569_v8 = vpop.eup %1568 }
 0x1fc   : > { %v980_v14 = vmul.f32 %v1569_v8, %v979_v9 }
 0x1fd   : > { %v966_v10 = vadd.f32 %v965_v7, %v951_v6 }
 0x1ff   : > { %v1571_v13 = vpop.eup %1570  ;;  %v981_v15 = vadd.f32 %v980_v14, %v966_v10 }
 0x200   : > { %v995_v16 = vmul.f32 %v1571_v13, %v994_v11 }
 0x202   : > { %v996_v21 = vadd.f32 %v995_v16, %v981_v15 }
 0x204   : > { %v1573_v20 = vpop.eup %1572 }
 0x205   : > { %v1010_v22 = vmul.f32 %v1573_v20, %v1009_v17 }
 0x207   : > { %v1011_v23 = vadd.f32 %v1010_v22, %v996_v21 }
 0x209   : > { %v1017_v24 = vsel %vm1016_vm4, %v1011_v23, -1000000.0 }
 0x20a   : > { %v1019_v25 = vsel %vm447_vm3, %v1017_v24, -inf }
 0x20b   : > { %1020 = vmax.xlane.f32.xlu0 %v1019_v25 }
 0x298   : > { %v1021_v26 = vpop.xlane.xlu0 %1020 }
 0x299   : > { %v1022_v27 = vsub.f32 %v1017_v24, %v1021_v26 }
 0x29b   : > { %v1023_v28 = vmul.f32 1.442695, %v1022_v27 }
 0x29d   : > { %1574 = vpow2.f32 %v1023_v28 }
 0x2a7   : > { %v1575_v29 = vpop.eup %1574 }
 0x2a8   : > { %v1025_v30 = vsel %vm447_vm3, %v1575_v29, 0.0 }
 0x2a9   : > { %1026 = vadd.xlane.f32.xlu1 %v1025_v30 }
 0x336   : > { %v1027_v34 = vpop.xlane.xlu1 %1026 }
 0x337   : > { %1576 = vrcp.f32 %v1027_v34 }
 0x341   : > { %v1577_v35 = vpop.eup %1576 }
 0x342   : > { %v1029_v36 = vmul.f32 %v1577_v35, %v1575_v29 }
 0x344   : > { %1358 = vmatmul.mubr.msk.f32.vlgmr.msra.gmra.mrb[2].mxu1 %vm447_vm3, %v1029_v36 }
 0x417   : > { %v1101_v37 = vpop.f32.mrb[2].mxu1 }
 0x418   : > { %1105 = vst [vmem:[%s315_s27] sm:$0xff] %v1101_v37  ;;  %v1359_v38 = vpop.f32.mrb[3].mxu1 }
 0x419   : > { %1618 = shalt.err (!%p1615_p8)
}
 0x41a   : > { %s1619_s21 = scalar_lea.hbm %s1973_s12, 128  ;;  %s1623_s26 = scalar_lea.hbm %s2025_s7, 256 }
 0x41b   : > { %p1620_p10 = scmp.ne.s32.totalorder %s1973_s12, %s1619_s21  ;;  %p1624_p0 = scmp.lt.u32.totalorder %s1973_s12, %s2025_s7 }
 0x41c   : > { %p1625_p1 = scmp.lt.u32.totalorder %s1623_s26, %s1619_s21  ;;  %p1627_p3 = scmp.lt.u32.totalorder %s1619_s21, %s1973_s12 }
 0x41d   : > { %p1621_p11 = pnand %p1620_p10, %p1812_p9 }
 0x41e   : > { %p1626_p2 = por %p1625_p1, %p1624_p0 }
 0x41f   : > { %p1622_p12 = pneg %p1621_p11 }
 0x420   : > { %p1628_p4 = por %p1627_p3, %p1626_p2 }
 0x422   : > { %p1629_p5 = pnand %p1628_p4, %p1622_p12 }
 0x424   : > { %1632 = shalt.err (!%p1629_p5)
}
 0x425   : > { %1379 = dma.vmem_to_hbm [thread:$0]  (%p1812_p9), %s1968_s28, 128, %s1973_s12, %s1107_s14  }
 0x426 PF: > { %p1391_p6 = scmp.ge.s32.totalorder %s1689_s10, 2  ;;  %s1133_s11 = sand.u32 1, %s1669_s29  }
 0x427   : > { %s1134_s24 = scalar_lea.sflag [#allocation6], %s1133_s11 }
 0x428   : > { %p1386_p7 = pnand %p1391_p6, %p1819_p13 }
 0x42a   : > { %1664 = dma.done.wait (!%p1386_p7), %s1134_s24, 128  }
 0x42b   : > { %1666 = vsyncadd (!%p1386_p7), %s1134_s24, 4294967168  ;;  %s27_s10 = sadd.s32 1, %s1689_s10   ;;  %s2030_s29 = smov %s1673_s30 }
 0x42c   : > { %p24_p8 = scmp.ge.s32.totalorder %s27_s10, 4   ;;  %s2031_s30 = smov %s1677_s0 }
 0x42d   : > { %s2032_s0 = smov %s1825_s18  ;;  %s2033_s8 = smov %s1685_s9 }
 0x42e   : > { %s2034_s9 = smov %s2036_s13  ;;  %26 = sbr.rel (!%p24_p8) target bundleno = 20 (0x14), region = 94 }
 0x435   :  { %1139 = vsyncpa [#allocation6], 1 }
 0x436   :  { %1141 = vsyncpa [#allocation6 + $0x1], 1 }
 0x437   :  { %1142 = vsyncpa [#allocation7], 1 }
 0x438   :  { %1144 = vsyncpa [#allocation7 + $0x1], 1 }

</bundles_post_ra>
